<compile_context>
chip_gen: v7x
topology: tpu7x:2x2x1
jax: 0.10.0
libtpu: 0.0.40
codegen_flags: <defaults>
</compile_context>

<pallas_src>
import jax
import jax.numpy as jnp
from jax.experimental import pallas as pl
from jax.experimental.pallas import tpu as pltpu


def mid_loss(x, wa, ba, wb, bb, target, *, block_b=512):
    """Fused MidLoss for a Linear midpoint model.

    Returns (loss, w_mid, b_mid); w_mid/b_mid mirror the in-place update of
    modelb's parameters in the PyTorch reference (and alias wb/bb buffers).
    """
    B, D_in = x.shape
    D_out = wa.shape[0]
    ba2 = ba.reshape(1, D_out)
    bb2 = bb.reshape(1, D_out)

    itemsize = 4
    weight_bytes = D_out * D_in * itemsize
    bias_bytes = D_out * itemsize

    # --- generation-aware VMEM budget -------------------------------------
    try:
        vmem_cap = int(pltpu.get_tpu_info().vmem_capacity_bytes)
    except Exception:
        vmem_cap = 64 * 1024 * 1024  # conservative (v7x per-core) fallback
    usable = max(vmem_cap - 16 * 1024 * 1024, 8 * 1024 * 1024)

    # Resident (non-streamed) footprint: wa/wb (worst case double-buffered),
    # ba/bb, wmid/bmid outputs, transposed-weight scratch, SSE accumulator.
    resident = (4 * weight_bytes + 4 * bias_bytes
                + weight_bytes + bias_bytes
                + weight_bytes
                + bias_bytes)

    # --- batch tile: big, VMEM-capped, masked partial last tile -----------
    stream_budget = max(usable // 2 - resident, 1 * 1024 * 1024)
    max_tb = max((stream_budget // (2 * (D_in + D_out) * itemsize)) // 8 * 8, 8)
    block_b = max(8, (block_b // 8) * 8)
    tb_cap = min(block_b, max_tb)
    tb = B if B <= tb_cap else tb_cap          # tb == B (full dim) or multiple of 8
    n_b = pl.cdiv(B, tb)
    has_tail = (B % tb) != 0
    inv_n = 1.0 / float(B * D_out)             # MSELoss(reduction='mean') denominator

    vmem_need = resident + 2 * tb * (D_in + D_out) * itemsize
    vmem_limit = int(min(max(2 * vmem_need, 4 * 1024 * 1024), usable))

    def kernel(x_ref, wa_ref, wb_ref, ba_ref, bb_ref, t_ref,
               loss_ref, wmid_ref, bmid_ref, acc_ref, wmid_t_ref):
        i = pl.program_id(0)

        # One-time parameter midpoint, written into the resident output blocks
        # (constant index_map) and into a transposed VMEM copy for the MXU.
        @pl.when(i == 0)
        def _init():
            w_mid = 0.5 * (wa_ref[...] + wb_ref[...])       # (D_out, D_in)
            wmid_ref[...] = w_mid
            wmid_t_ref[...] = w_mid.T                        # one XLU transpose, reused every step
            bmid_ref[...] = 0.5 * (ba_ref[...] + bb_ref[...])
            acc_ref[...] = jnp.zeros_like(acc_ref)

        # z = x @ W_mid^T + b_mid ; canonical (M,K)x(K,N) MXU feed.
        z = jnp.dot(x_ref[...], wmid_t_ref[...],
                    preferred_element_type=jnp.float32) + bmid_ref[...]
        diff = z - t_ref[...]
        sq = diff * diff
        if has_tail:
            # Mask padded rows of the partial last tile (OOB reads are garbage).
            rows = i * tb + jax.lax.broadcasted_iota(jnp.int32, (tb, 1), 0)
            sq = jnp.where(rows < B, sq, 0.0)

        # Lane-parallel accumulator: cheap axis-0 (sublane) reduce per step only.
        acc_ref[...] = acc_ref[...] + jnp.sum(sq, axis=0, keepdims=True)

        @pl.when(i == pl.num_programs(0) - 1)
        def _finalize():
            # Single cross-lane reduce + scale, scalar written straight to SMEM.
            loss_ref[0, 0] = jnp.sum(acc_ref[...]) * inv_n

    def build_call(single_buffer_params):
        param_kw = {}
        if single_buffer_params:
            # Constant-index inputs fetched once -> no need for double buffers.
            param_kw = dict(pipeline_mode=pl.Buffered(1))
        in_specs = [
            pl.BlockSpec((tb, D_in), lambda i: (i, 0)),                  # x (batch-tiled)
            pl.BlockSpec((D_out, D_in), lambda i: (0, 0), **param_kw),   # wa (resident)
            pl.BlockSpec((D_out, D_in), lambda i: (0, 0), **param_kw),   # wb (resident)
            pl.BlockSpec((1, D_out), lambda i: (0, 0), **param_kw),      # ba
            pl.BlockSpec((1, D_out), lambda i: (0, 0), **param_kw),      # bb
            pl.BlockSpec((tb, D_out), lambda i: (i, 0)),                 # target (batch-tiled)
        ]
        out_specs = [
            pl.BlockSpec(memory_space=pltpu.MemorySpace.SMEM),           # loss scalar
            pl.BlockSpec((D_out, D_in), lambda i: (0, 0)),               # averaged weight
            pl.BlockSpec((1, D_out), lambda i: (0, 0)),                  # averaged bias
        ]
        return pl.pallas_call(
            kernel,
            grid=(n_b,),
            in_specs=in_specs,
            out_specs=out_specs,
            out_shape=[
                jax.ShapeDtypeStruct((1, 1), jnp.float32),
                jax.ShapeDtypeStruct((D_out, D_in), jnp.float32),
                jax.ShapeDtypeStruct((1, D_out), jnp.float32),
            ],
            scratch_shapes=[
                pltpu.VMEM((1, D_out), jnp.float32),       # lane-parallel SSE accumulator
                pltpu.VMEM((D_in, D_out), jnp.float32),    # transposed midpoint weight
            ],
            # Mirror PyTorch's in-place update: wb -> w_mid, bb -> b_mid.
            input_output_aliases={2: 1, 4: 2},
            compiler_params=pltpu.CompilerParams(
                # Batch axis carries the loss accumulator and the one-time
                # parameter averaging, so it must stay sequential.
                dimension_semantics=("arbitrary",),
                vmem_limit_bytes=vmem_limit,
            ),
        )(x, wa, wb, ba2, bb2, target)

    try:
        loss, w_mid, b_mid = build_call(True)
    except Exception:
        # pipeline_mode=Buffered(1) not accepted on this jax version -> default buffering.
        loss, w_mid, b_mid = build_call(False)

    return loss[0, 0], w_mid, b_mid.reshape(D_out)


if __name__ == "__main__":
    # Linear(128 -> 128) midpoint model. B=270 with block_b=128 exercises a
    # multi-step grid (3 batch tiles) AND a masked partial last tile (14 rows).
    B, D_in, D_out = 270, 128, 128

    key = jax.random.PRNGKey(0)
    k_x, k_wa, k_ba, k_wb, k_bb, k_t = jax.random.split(key, 6)

    x      = jax.random.normal(k_x, (B, D_in), dtype=jnp.float32)
    target = jax.random.normal(k_t, (B, D_out), dtype=jnp.float32)
    # modela (frozen) parameters
    wa = jax.random.normal(k_wa, (D_out, D_in), dtype=jnp.float32) * 0.1
    ba = jax.random.normal(k_ba, (D_out,), dtype=jnp.float32) * 0.1
    # modelb parameters (the ones averaged "in place")
    wb = jax.random.normal(k_wb, (D_out, D_in), dtype=jnp.float32) * 0.1
    bb = jax.random.normal(k_bb, (D_out,), dtype=jnp.float32) * 0.1

    # Pure-JAX reference, computed BEFORE the kernel call (wb/bb are aliased
    # into the kernel outputs, mirroring the PyTorch in-place update).
    w_ref = 0.5 * (wb + wa)
    b_ref = 0.5 * (bb + ba)
    z_ref = jax.lax.dot_general(
        x, w_ref, dimension_numbers=(((1,), (1,)), ((), ())),
        precision=jax.lax.Precision.HIGHEST,
        preferred_element_type=jnp.float32) + b_ref
    loss_ref = jnp.mean((z_ref - target) ** 2)
    jax.block_until_ready((w_ref, b_ref, loss_ref))

    loss, w_mid, b_mid = mid_loss(x, wa, ba, wb, bb, target, block_b=128)
    jax.block_until_ready((loss, w_mid, b_mid))

    assert jnp.allclose(loss, loss_ref, rtol=1e-3, atol=1e-3), (loss, loss_ref)
    assert jnp.allclose(w_mid, w_ref, rtol=1e-6, atol=1e-6)
    assert jnp.allclose(b_mid, b_ref, rtol=1e-6, atol=1e-6)

    print("KERNEL_OK")
</pallas_src>

<mosaic_0001>
module attributes {stable_mosaic.version = 11 : i64} {
  func.func @kernel(%arg0: i32, %arg1: memref<128x128xf32, #tpu.memory_space<vmem>>, %arg2: memref<128x128xf32, #tpu.memory_space<vmem>>, %arg3: memref<128x128xf32, #tpu.memory_space<vmem>>, %arg4: memref<1x128xf32, #tpu.memory_space<vmem>>, %arg5: memref<1x128xf32, #tpu.memory_space<vmem>>, %arg6: memref<128x128xf32, #tpu.memory_space<vmem>>, %arg7: memref<1x1xf32, #tpu.memory_space<smem>>, %arg8: memref<128x128xf32, #tpu.memory_space<vmem>>, %arg9: memref<1x128xf32, #tpu.memory_space<vmem>>, %arg10: memref<1x128xf32, #tpu.memory_space<vmem>>, %arg11: memref<128x128xf32, #tpu.memory_space<vmem>>) attributes {dimension_semantics = [#tpu.dimension_semantics<arbitrary>], iteration_bounds = array<i64: 3>, scalar_prefetch = 0 : i64, scratch_operands = 2 : i64, tpu.core_type = #tpu.core_type<tc>, window_params = [{transform_indices = @transform_0, window_bounds = array<i64: 128, 128>}, {pipeline_mode = #tpu.pipeline_mode<synchronous>, transform_indices = @transform_1, window_bounds = array<i64: 128, 128>}, {pipeline_mode = #tpu.pipeline_mode<synchronous>, transform_indices = @transform_2, window_bounds = array<i64: 128, 128>}, {pipeline_mode = #tpu.pipeline_mode<synchronous>, transform_indices = @transform_3, window_bounds = array<i64: 1, 128>}, {pipeline_mode = #tpu.pipeline_mode<synchronous>, transform_indices = @transform_4, window_bounds = array<i64: 1, 128>}, {transform_indices = @transform_5, window_bounds = array<i64: 128, 128>}, {transform_indices = @transform_6, window_bounds = array<i64: 1, 1>}, {pipeline_mode = #tpu.pipeline_mode<synchronous>, transform_indices = @transform_7, window_bounds = array<i64: 128, 128>}, {pipeline_mode = #tpu.pipeline_mode<synchronous>, transform_indices = @transform_8, window_bounds = array<i64: 1, 128>}]} {
    %c0_i32 = arith.constant 0 : i32
    %0 = arith.cmpi eq, %arg0, %c0_i32 : i32
    %1 = arith.extui %0 : i1 to i32
    %c0_i32_0 = arith.constant 0 : i32
    %2 = arith.cmpi ne, %1, %c0_i32_0 : i32
    scf.if %2 {
      %c0_15 = arith.constant 0 : index
      %c0_16 = arith.constant 0 : index
      %30 = vector.load %arg2[%c0_15, %c0_16] : memref<128x128xf32, #tpu.memory_space<vmem>>, vector<128x128xf32>
      %c0_17 = arith.constant 0 : index
      %c0_18 = arith.constant 0 : index
      %31 = vector.load %arg3[%c0_17, %c0_18] : memref<128x128xf32, #tpu.memory_space<vmem>>, vector<128x128xf32>
      %32 = arith.addf %30, %31 : vector<128x128xf32>
      %cst_19 = arith.constant 5.000000e-01 : f32
      %33 = vector.broadcast %cst_19 : f32 to vector<128x128xf32>
      %34 = arith.mulf %33, %32 : vector<128x128xf32>
      %c0_20 = arith.constant 0 : index
      %c0_21 = arith.constant 0 : index
      %35 = vector.load %arg8[%c0_20, %c0_21] : memref<128x128xf32, #tpu.memory_space<vmem>>, vector<128x128xf32>
      tpu.vector_store %arg8[%c0_20, %c0_21], %34 {strides = array<i32>} : memref<128x128xf32, #tpu.memory_space<vmem>>, vector<128x128xf32>,
      %36 = tpu.transpose %34, [1, 0] : vector<128x128xf32> -> vector<128x128xf32>
      %c0_22 = arith.constant 0 : index
      %c0_23 = arith.constant 0 : index
      %37 = vector.load %arg11[%c0_22, %c0_23] : memref<128x128xf32, #tpu.memory_space<vmem>>, vector<128x128xf32>
      tpu.vector_store %arg11[%c0_22, %c0_23], %36 {strides = array<i32>} : memref<128x128xf32, #tpu.memory_space<vmem>>, vector<128x128xf32>,
      %c0_24 = arith.constant 0 : index
      %c0_25 = arith.constant 0 : index
      %38 = vector.load %arg4[%c0_24, %c0_25] : memref<1x128xf32, #tpu.memory_space<vmem>>, vector<1x128xf32>
      %c0_26 = arith.constant 0 : index
      %c0_27 = arith.constant 0 : index
      %39 = vector.load %arg5[%c0_26, %c0_27] : memref<1x128xf32, #tpu.memory_space<vmem>>, vector<1x128xf32>
      %40 = arith.addf %38, %39 : vector<1x128xf32>
      %cst_28 = arith.constant 5.000000e-01 : f32
      %41 = vector.broadcast %cst_28 : f32 to vector<1x128xf32>
      %42 = arith.mulf %41, %40 : vector<1x128xf32>
      %c0_29 = arith.constant 0 : index
      %c0_30 = arith.constant 0 : index
      %43 = vector.load %arg9[%c0_29, %c0_30] : memref<1x128xf32, #tpu.memory_space<vmem>>, vector<1x128xf32>
      tpu.vector_store %arg9[%c0_29, %c0_30], %42 {strides = array<i32>} : memref<1x128xf32, #tpu.memory_space<vmem>>, vector<1x128xf32>,
      %cst_31 = arith.constant 0.000000e+00 : f32
      %44 = vector.broadcast %cst_31 : f32 to vector<1x128xf32>
      %c0_32 = arith.constant 0 : index
      %c0_33 = arith.constant 0 : index
      %45 = vector.load %arg10[%c0_32, %c0_33] : memref<1x128xf32, #tpu.memory_space<vmem>>, vector<1x128xf32>
      tpu.vector_store %arg10[%c0_32, %c0_33], %44 {strides = array<i32>} : memref<1x128xf32, #tpu.memory_space<vmem>>, vector<1x128xf32>,
    } else {
    }
    %c0 = arith.constant 0 : index
    %c0_1 = arith.constant 0 : index
    %3 = vector.load %arg1[%c0, %c0_1] : memref<128x128xf32, #tpu.memory_space<vmem>>, vector<128x128xf32>
    %c0_2 = arith.constant 0 : index
    %c0_3 = arith.constant 0 : index
    %4 = vector.load %arg11[%c0_2, %c0_3] : memref<128x128xf32, #tpu.memory_space<vmem>>, vector<128x128xf32>
    %cst = arith.constant dense<0.000000e+00> : vector<128x128xf32>
    %5 = tpu.matmul %3, %4, %cst {dimension_numbers = #tpu.dot_dimension_numbers<[1], [0], [0], [1], [0, 0, 1, 1], [], []>} : vector<128x128xf32>, vector<128x128xf32>, vector<128x128xf32> -> vector<128x128xf32>
    %c0_4 = arith.constant 0 : index
    %c0_5 = arith.constant 0 : index
    %6 = vector.load %arg9[%c0_4, %c0_5] : memref<1x128xf32, #tpu.memory_space<vmem>>, vector<1x128xf32>
    %7 = vector.broadcast %6 : vector<1x128xf32> to vector<128x128xf32>
    %8 = arith.addf %5, %7 : vector<128x128xf32>
    %c0_6 = arith.constant 0 : index
    %c0_7 = arith.constant 0 : index
    %9 = vector.load %arg6[%c0_6, %c0_7] : memref<128x128xf32, #tpu.memory_space<vmem>>, vector<128x128xf32>
    %10 = arith.subf %8, %9 : vector<128x128xf32>
    %11 = arith.mulf %10, %10 : vector<128x128xf32>
    %c128_i32 = arith.constant 128 : i32
    %12 = arith.muli %arg0, %c128_i32 : i32
    %13 = tpu.iota {dimensions = array<i32: 0>} : vector<128x1xi32>
    %14 = vector.broadcast %12 : i32 to vector<128x1xi32>
    %15 = arith.addi %14, %13 : vector<128x1xi32>
    %c270_i32 = arith.constant 270 : i32
    %16 = vector.broadcast %c270_i32 : i32 to vector<128x1xi32>
    %17 = arith.cmpi slt, %15, %16 : vector<128x1xi32>
    %cst_8 = arith.constant 0.000000e+00 : f32
    %18 = vector.shape_cast %17 : vector<128x1xi1> to vector<128x1xi1>
    %19 = vector.broadcast %18 : vector<128x1xi1> to vector<128x128xi1>
    %20 = vector.broadcast %cst_8 : f32 to vector<128x128xf32>
    %21 = arith.select %19, %11, %20 : vector<128x128xi1>, vector<128x128xf32>
    %c0_9 = arith.constant 0 : index
    %c0_10 = arith.constant 0 : index
    %22 = vector.load %arg10[%c0_9, %c0_10] : memref<1x128xf32, #tpu.memory_space<vmem>>, vector<1x128xf32>
    %cst_11 = arith.constant dense<0.000000e+00> : vector<128xf32>
    %23 = vector.multi_reduction <add>, %21, %cst_11 [0] : vector<128x128xf32> to vector<128xf32>
    %24 = vector.shape_cast %23 : vector<128xf32> to vector<1x128xf32>
    %25 = arith.addf %22, %24 : vector<1x128xf32>
    %c0_12 = arith.constant 0 : index
    %c0_13 = arith.constant 0 : index
    %26 = vector.load %arg10[%c0_12, %c0_13] : memref<1x128xf32, #tpu.memory_space<vmem>>, vector<1x128xf32>
    tpu.vector_store %arg10[%c0_12, %c0_13], %25 {strides = array<i32>} : memref<1x128xf32, #tpu.memory_space<vmem>>, vector<1x128xf32>,
    %c2_i32 = arith.constant 2 : i32
    %27 = arith.cmpi eq, %arg0, %c2_i32 : i32
    %28 = arith.extui %27 : i1 to i32
    %c0_i32_14 = arith.constant 0 : i32
    %29 = arith.cmpi ne, %28, %c0_i32_14 : i32
    scf.if %29 {
      %c0_15 = arith.constant 0 : index
      %c0_16 = arith.constant 0 : index
      %30 = vector.load %arg10[%c0_15, %c0_16] : memref<1x128xf32, #tpu.memory_space<vmem>>, vector<1x128xf32>
      %31 = vector.shape_cast %30 : vector<1x128xf32> to vector<1x1x128xf32>
      %cst_17 = arith.constant dense<0.000000e+00> : vector<1xf32>
      %32 = vector.multi_reduction <add>, %31, %cst_17 [1, 2] : vector<1x1x128xf32> to vector<1xf32>
      %33 = vector.shape_cast %32 : vector<1xf32> to vector<1x1x1xf32>
      %34 = vector.extract %33[0, 0, 0] : f32 from vector<1x1x1xf32>
      %cst_18 = arith.constant 2.89351847E-5 : f32
      %35 = arith.mulf %34, %cst_18 : f32
      %c0_19 = arith.constant 0 : index
      %c0_20 = arith.constant 0 : index
      %36 = memref.load %arg7[%c0_19, %c0_20] : memref<1x1xf32, #tpu.memory_space<smem>>
      memref.store %35, %arg7[%c0_19, %c0_20] : memref<1x1xf32, #tpu.memory_space<smem>>
    } else {
    }
    return
  }
  func.func @transform_0(%arg0: i32) -> (i32, i32) {
    %c0_i32 = arith.constant 0 : i32
    %c0_i32_0 = arith.constant 0 : i32
    return %arg0, %c0_i32 : i32, i32
  }
  func.func @transform_1(%arg0: i32) -> (i32, i32) {
    %c0_i32 = arith.constant 0 : i32
    %c0_i32_0 = arith.constant 0 : i32
    %c0_i32_1 = arith.constant 0 : i32
    return %c0_i32, %c0_i32_0 : i32, i32
  }
  func.func @transform_2(%arg0: i32) -> (i32, i32) {
    %c0_i32 = arith.constant 0 : i32
    %c0_i32_0 = arith.constant 0 : i32
    %c0_i32_1 = arith.constant 0 : i32
    return %c0_i32, %c0_i32_0 : i32, i32
  }
  func.func @transform_3(%arg0: i32) -> (i32, i32) {
    %c0_i32 = arith.constant 0 : i32
    %c0_i32_0 = arith.constant 0 : i32
    %c0_i32_1 = arith.constant 0 : i32
    return %c0_i32, %c0_i32_0 : i32, i32
  }
  func.func @transform_4(%arg0: i32) -> (i32, i32) {
    %c0_i32 = arith.constant 0 : i32
    %c0_i32_0 = arith.constant 0 : i32
    %c0_i32_1 = arith.constant 0 : i32
    return %c0_i32, %c0_i32_0 : i32, i32
  }
  func.func @transform_5(%arg0: i32) -> (i32, i32) {
    %c0_i32 = arith.constant 0 : i32
    %c0_i32_0 = arith.constant 0 : i32
    return %arg0, %c0_i32 : i32, i32
  }
  func.func @transform_6(%arg0: i32) -> (i32, i32) {
    %c0_i32 = arith.constant 0 : i32
    %c0_i32_0 = arith.constant 0 : i32
    %c0_i32_1 = arith.constant 0 : i32
    return %c0_i32, %c0_i32_0 : i32, i32
  }
  func.func @transform_7(%arg0: i32) -> (i32, i32) {
    %c0_i32 = arith.constant 0 : i32
    %c0_i32_0 = arith.constant 0 : i32
    %c0_i32_1 = arith.constant 0 : i32
    return %c0_i32, %c0_i32_0 : i32, i32
  }
  func.func @transform_8(%arg0: i32) -> (i32, i32) {
    %c0_i32 = arith.constant 0 : i32
    %c0_i32_0 = arith.constant 0 : i32
    %c0_i32_1 = arith.constant 0 : i32
    return %c0_i32, %c0_i32_0 : i32, i32
  }
}

module attributes {stable_mosaic.version = 11 : i64} {
  func.func @kernel(%arg0: i32, %arg1: memref<128x128xf32, #tpu.memory_space<vmem>>, %arg2: memref<128x128xf32, #tpu.memory_space<vmem>>, %arg3: memref<128x128xf32, #tpu.memory_space<vmem>>, %arg4: memref<1x128xf32, #tpu.memory_space<vmem>>, %arg5: memref<1x128xf32, #tpu.memory_space<vmem>>, %arg6: memref<128x128xf32, #tpu.memory_space<vmem>>, %arg7: memref<1x1xf32, #tpu.memory_space<smem>>, %arg8: memref<128x128xf32, #tpu.memory_space<vmem>>, %arg9: memref<1x128xf32, #tpu.memory_space<vmem>>, %arg10: memref<1x128xf32, #tpu.memory_space<vmem>>, %arg11: memref<128x128xf32, #tpu.memory_space<vmem>>) attributes {dimension_semantics = [#tpu.dimension_semantics<arbitrary>], iteration_bounds = array<i64: 3>, scalar_prefetch = 0 : i64, scratch_operands = 2 : i64, tpu.core_type = #tpu.core_type<tc>, window_params = [{transform_indices = @transform_0, window_bounds = array<i64: 128, 128>}, {pipeline_mode = #tpu.pipeline_mode<synchronous>, transform_indices = @transform_1, window_bounds = array<i64: 128, 128>}, {pipeline_mode = #tpu.pipeline_mode<synchronous>, transform_indices = @transform_2, window_bounds = array<i64: 128, 128>}, {pipeline_mode = #tpu.pipeline_mode<synchronous>, transform_indices = @transform_3, window_bounds = array<i64: 1, 128>}, {pipeline_mode = #tpu.pipeline_mode<synchronous>, transform_indices = @transform_4, window_bounds = array<i64: 1, 128>}, {transform_indices = @transform_5, window_bounds = array<i64: 128, 128>}, {transform_indices = @transform_6, window_bounds = array<i64: 1, 1>}, {pipeline_mode = #tpu.pipeline_mode<synchronous>, transform_indices = @transform_7, window_bounds = array<i64: 128, 128>}, {pipeline_mode = #tpu.pipeline_mode<synchronous>, transform_indices = @transform_8, window_bounds = array<i64: 1, 128>}]} {
    %c0_i32 = arith.constant 0 : i32
    %0 = arith.cmpi eq, %arg0, %c0_i32 : i32
    %1 = arith.extui %0 : i1 to i32
    %c0_i32_0 = arith.constant 0 : i32
    %2 = arith.cmpi ne, %1, %c0_i32_0 : i32
    scf.if %2 {
      %c0_15 = arith.constant 0 : index
      %c0_16 = arith.constant 0 : index
      %30 = vector.load %arg2[%c0_15, %c0_16] : memref<128x128xf32, #tpu.memory_space<vmem>>, vector<128x128xf32>
      %c0_17 = arith.constant 0 : index
      %c0_18 = arith.constant 0 : index
      %31 = vector.load %arg3[%c0_17, %c0_18] : memref<128x128xf32, #tpu.memory_space<vmem>>, vector<128x128xf32>
      %32 = arith.addf %30, %31 : vector<128x128xf32>
      %cst_19 = arith.constant 5.000000e-01 : f32
      %33 = vector.broadcast %cst_19 : f32 to vector<128x128xf32>
      %34 = arith.mulf %33, %32 : vector<128x128xf32>
      %c0_20 = arith.constant 0 : index
      %c0_21 = arith.constant 0 : index
      %35 = vector.load %arg8[%c0_20, %c0_21] : memref<128x128xf32, #tpu.memory_space<vmem>>, vector<128x128xf32>
      tpu.vector_store %arg8[%c0_20, %c0_21], %34 {strides = array<i32>} : memref<128x128xf32, #tpu.memory_space<vmem>>, vector<128x128xf32>,
      %36 = tpu.transpose %34, [1, 0] : vector<128x128xf32> -> vector<128x128xf32>
      %c0_22 = arith.constant 0 : index
      %c0_23 = arith.constant 0 : index
      %37 = vector.load %arg11[%c0_22, %c0_23] : memref<128x128xf32, #tpu.memory_space<vmem>>, vector<128x128xf32>
      tpu.vector_store %arg11[%c0_22, %c0_23], %36 {strides = array<i32>} : memref<128x128xf32, #tpu.memory_space<vmem>>, vector<128x128xf32>,
      %c0_24 = arith.constant 0 : index
      %c0_25 = arith.constant 0 : index
      %38 = vector.load %arg4[%c0_24, %c0_25] : memref<1x128xf32, #tpu.memory_space<vmem>>, vector<1x128xf32>
      %c0_26 = arith.constant 0 : index
      %c0_27 = arith.constant 0 : index
      %39 = vector.load %arg5[%c0_26, %c0_27] : memref<1x128xf32, #tpu.memory_space<vmem>>, vector<1x128xf32>
      %40 = arith.addf %38, %39 : vector<1x128xf32>
      %cst_28 = arith.constant 5.000000e-01 : f32
      %41 = vector.broadcast %cst_28 : f32 to vector<1x128xf32>
      %42 = arith.mulf %41, %40 : vector<1x128xf32>
      %c0_29 = arith.constant 0 : index
      %c0_30 = arith.constant 0 : index
      %43 = vector.load %arg9[%c0_29, %c0_30] : memref<1x128xf32, #tpu.memory_space<vmem>>, vector<1x128xf32>
      tpu.vector_store %arg9[%c0_29, %c0_30], %42 {strides = array<i32>} : memref<1x128xf32, #tpu.memory_space<vmem>>, vector<1x128xf32>,
      %cst_31 = arith.constant 0.000000e+00 : f32
      %44 = vector.broadcast %cst_31 : f32 to vector<1x128xf32>
      %c0_32 = arith.constant 0 : index
      %c0_33 = arith.constant 0 : index
      %45 = vector.load %arg10[%c0_32, %c0_33] : memref<1x128xf32, #tpu.memory_space<vmem>>, vector<1x128xf32>
      tpu.vector_store %arg10[%c0_32, %c0_33], %44 {strides = array<i32>} : memref<1x128xf32, #tpu.memory_space<vmem>>, vector<1x128xf32>,
    } else {
    }
    %c0 = arith.constant 0 : index
    %c0_1 = arith.constant 0 : index
    %3 = vector.load %arg1[%c0, %c0_1] : memref<128x128xf32, #tpu.memory_space<vmem>>, vector<128x128xf32>
    %c0_2 = arith.constant 0 : index
    %c0_3 = arith.constant 0 : index
    %4 = vector.load %arg11[%c0_2, %c0_3] : memref<128x128xf32, #tpu.memory_space<vmem>>, vector<128x128xf32>
    %cst = arith.constant dense<0.000000e+00> : vector<128x128xf32>
    %5 = tpu.matmul %3, %4, %cst {dimension_numbers = #tpu.dot_dimension_numbers<[1], [0], [0], [1], [0, 0, 1, 1], [], []>} : vector<128x128xf32>, vector<128x128xf32>, vector<128x128xf32> -> vector<128x128xf32>
    %c0_4 = arith.constant 0 : index
    %c0_5 = arith.constant 0 : index
    %6 = vector.load %arg9[%c0_4, %c0_5] : memref<1x128xf32, #tpu.memory_space<vmem>>, vector<1x128xf32>
    %7 = vector.broadcast %6 : vector<1x128xf32> to vector<128x128xf32>
    %8 = arith.addf %5, %7 : vector<128x128xf32>
    %c0_6 = arith.constant 0 : index
    %c0_7 = arith.constant 0 : index
    %9 = vector.load %arg6[%c0_6, %c0_7] : memref<128x128xf32, #tpu.memory_space<vmem>>, vector<128x128xf32>
    %10 = arith.subf %8, %9 : vector<128x128xf32>
    %11 = arith.mulf %10, %10 : vector<128x128xf32>
    %c128_i32 = arith.constant 128 : i32
    %12 = arith.muli %arg0, %c128_i32 : i32
    %13 = tpu.iota {dimensions = array<i32: 0>} : vector<128x1xi32>
    %14 = vector.broadcast %12 : i32 to vector<128x1xi32>
    %15 = arith.addi %14, %13 : vector<128x1xi32>
    %c270_i32 = arith.constant 270 : i32
    %16 = vector.broadcast %c270_i32 : i32 to vector<128x1xi32>
    %17 = arith.cmpi slt, %15, %16 : vector<128x1xi32>
    %cst_8 = arith.constant 0.000000e+00 : f32
    %18 = vector.shape_cast %17 : vector<128x1xi1> to vector<128x1xi1>
    %19 = vector.broadcast %18 : vector<128x1xi1> to vector<128x128xi1>
    %20 = vector.broadcast %cst_8 : f32 to vector<128x128xf32>
    %21 = arith.select %19, %11, %20 : vector<128x128xi1>, vector<128x128xf32>
    %c0_9 = arith.constant 0 : index
    %c0_10 = arith.constant 0 : index
    %22 = vector.load %arg10[%c0_9, %c0_10] : memref<1x128xf32, #tpu.memory_space<vmem>>, vector<1x128xf32>
    %cst_11 = arith.constant dense<0.000000e+00> : vector<128xf32>
    %23 = vector.multi_reduction <add>, %21, %cst_11 [0] : vector<128x128xf32> to vector<128xf32>
    %24 = vector.shape_cast %23 : vector<128xf32> to vector<1x128xf32>
    %25 = arith.addf %22, %24 : vector<1x128xf32>
    %c0_12 = arith.constant 0 : index
    %c0_13 = arith.constant 0 : index
    %26 = vector.load %arg10[%c0_12, %c0_13] : memref<1x128xf32, #tpu.memory_space<vmem>>, vector<1x128xf32>
    tpu.vector_store %arg10[%c0_12, %c0_13], %25 {strides = array<i32>} : memref<1x128xf32, #tpu.memory_space<vmem>>, vector<1x128xf32>,
    %c2_i32 = arith.constant 2 : i32
    %27 = arith.cmpi eq, %arg0, %c2_i32 : i32
    %28 = arith.extui %27 : i1 to i32
    %c0_i32_14 = arith.constant 0 : i32
    %29 = arith.cmpi ne, %28, %c0_i32_14 : i32
    scf.if %29 {
      %c0_15 = arith.constant 0 : index
      %c0_16 = arith.constant 0 : index
      %30 = vector.load %arg10[%c0_15, %c0_16] : memref<1x128xf32, #tpu.memory_space<vmem>>, vector<1x128xf32>
      %31 = vector.shape_cast %30 : vector<1x128xf32> to vector<1x1x128xf32>
      %cst_17 = arith.constant dense<0.000000e+00> : vector<1xf32>
      %32 = vector.multi_reduction <add>, %31, %cst_17 [1, 2] : vector<1x1x128xf32> to vector<1xf32>
      %33 = vector.shape_cast %32 : vector<1xf32> to vector<1x1x1xf32>
      %34 = vector.extract %33[0, 0, 0] : f32 from vector<1x1x1xf32>
      %cst_18 = arith.constant 2.89351847E-5 : f32
      %35 = arith.mulf %34, %cst_18 : f32
      %c0_19 = arith.constant 0 : index
      %c0_20 = arith.constant 0 : index
      %36 = memref.load %arg7[%c0_19, %c0_20] : memref<1x1xf32, #tpu.memory_space<smem>>
      memref.store %35, %arg7[%c0_19, %c0_20] : memref<1x1xf32, #tpu.memory_space<smem>>
    } else {
    }
    return
  }
  func.func @transform_0(%arg0: i32) -> (i32, i32) {
    %c0_i32 = arith.constant 0 : i32
    %c0_i32_0 = arith.constant 0 : i32
    return %arg0, %c0_i32 : i32, i32
  }
  func.func @transform_1(%arg0: i32) -> (i32, i32) {
    %c0_i32 = arith.constant 0 : i32
    %c0_i32_0 = arith.constant 0 : i32
    %c0_i32_1 = arith.constant 0 : i32
    return %c0_i32, %c0_i32_0 : i32, i32
  }
  func.func @transform_2(%arg0: i32) -> (i32, i32) {
    %c0_i32 = arith.constant 0 : i32
    %c0_i32_0 = arith.constant 0 : i32
    %c0_i32_1 = arith.constant 0 : i32
    return %c0_i32, %c0_i32_0 : i32, i32
  }
  func.func @transform_3(%arg0: i32) -> (i32, i32) {
    %c0_i32 = arith.constant 0 : i32
    %c0_i32_0 = arith.constant 0 : i32
    %c0_i32_1 = arith.constant 0 : i32
    return %c0_i32, %c0_i32_0 : i32, i32
  }
  func.func @transform_4(%arg0: i32) -> (i32, i32) {
    %c0_i32 = arith.constant 0 : i32
    %c0_i32_0 = arith.constant 0 : i32
    %c0_i32_1 = arith.constant 0 : i32
    return %c0_i32, %c0_i32_0 : i32, i32
  }
  func.func @transform_5(%arg0: i32) -> (i32, i32) {
    %c0_i32 = arith.constant 0 : i32
    %c0_i32_0 = arith.constant 0 : i32
    return %arg0, %c0_i32 : i32, i32
  }
  func.func @transform_6(%arg0: i32) -> (i32, i32) {
    %c0_i32 = arith.constant 0 : i32
    %c0_i32_0 = arith.constant 0 : i32
    %c0_i32_1 = arith.constant 0 : i32
    return %c0_i32, %c0_i32_0 : i32, i32
  }
  func.func @transform_7(%arg0: i32) -> (i32, i32) {
    %c0_i32 = arith.constant 0 : i32
    %c0_i32_0 = arith.constant 0 : i32
    %c0_i32_1 = arith.constant 0 : i32
    return %c0_i32, %c0_i32_0 : i32, i32
  }
  func.func @transform_8(%arg0: i32) -> (i32, i32) {
    %c0_i32 = arith.constant 0 : i32
    %c0_i32_0 = arith.constant 0 : i32
    %c0_i32_1 = arith.constant 0 : i32
    return %c0_i32, %c0_i32_0 : i32, i32
  }
}

</mosaic_0001>

<bundles_post_ra>
// kernel: tpu_custom_call.1
= control target key start
LH: loop header
LB: loop body
LE: loop exit
PB: predicated region body
PF: predicated region fallthrough
CT: control target
= control target key end

     0   :  { %s2026_s0 = inlined_call_operand.vmem [shape: f32[270,128], index: 0, kind: input, shape index: {}]   ;;  %s2027_s1 = inlined_call_operand.hbm [shape: f32[128,128], index: 1, kind: input, shape index: {}]   ;;  %s2028_s2 = inlined_call_operand.hbm [shape: f32[128,128], index: 2, kind: input, shape index: {}, may-alias: {2,7}]   ;;  %s2029_s3 = inlined_call_operand.vmem [shape: f32[1,128], index: 3, kind: input, shape index: {}]   ;;  %s2030_s4 = inlined_call_operand.hbm [shape: f32[1,128], index: 4, kind: input, shape index: {}, may-alias: {4,8}]   ;;  %s2031_s5 = inlined_call_operand.hbm [shape: f32[270,128], index: 5, kind: input, shape index: {}]   ;;  %s2032_s6 = inlined_call_operand.hbm [shape: f32[1,1], index: 6, kind: output, shape index: {0}]   ;;  %s2033_s7 = inlined_call_operand.hbm [shape: f32[128,128], index: 7, kind: output, shape index: {1}, may-alias: {2,7}]   ;;  %s2034_s8 = inlined_call_operand.hbm [shape: f32[1,128], index: 8, kind: output, shape index: {2}, may-alias: {4,8}]  }
   0x1   :  { %2041 = sst [smem:[#allocation25_spill]] %s2034_s8 }
   0x2   :  { %14 = vsyncpa [#allocation5], 0 }
   0x3   :  { %15 = vsyncpa [#allocation9], 0 }
   0x4   :  { %16 = vsyncpa [#allocation12], 0 }
   0x5   :  { %18 = vsyncpa [#allocation12 + $0x1], 0 }
   0x6   :  { %19 = vsyncpa [#allocation7], 0 }
   0x7   :  { %20 = vsyncpa [#allocation6], 0 }
   0x8   :  { %21 = vsyncpa [#allocation16], 0  ;;  %s1617_s27 = smov 0   ;;  %s1619_s28 = smov 0  }
   0x9   :  { %s1621_s29 = smov 0   ;;  %s1623_s30 = smov 0  }
   0xa LB: > { %s1636_s9 = sadd.s32 4294967295, %s1556_s30   ;;  %s1639_s10 = sadd.s32 1, %s1556_s30   ;;  %s1556_s30 = sphi %s1623_s30, %s2058_s30   ;;  %s1552_s29 = sphi %s1621_s29, %s2062_s29   ;;  %s1548_s28 = sphi %s1619_s28, %s2061_s28   ;;  %s1544_s27 = sphi %s1617_s27, %s2060_s27  }
   0xb   : > { %2042 = sst [smem:[#allocation23_spill]] %s1639_s10  ;;  %s141_s11 = ssub.s32 %s1556_s30, %s1639_s10 }
   0xc   : > { %s144_s12 = sadd.s32 1, %s1552_s29  ;;  %p142_p0 = scmp.eq.s32.totalorder %s141_s11, 0 }
   0xd   : > { %p151_p1 = scmp.ne.s32.totalorder %s1552_s29, %s1548_s28  ;;  %p152_p2 = scmp.eq.s32.totalorder %s1556_s30, 0 }
   0xe   : > { %p157_p3 = scmp.ne.s32.totalorder %s1548_s28, %s1544_s27  ;;  %p2035_p5 = scmp.eq.s32.totalorder %s1636_s9, 0 }
   0xf   : > { %s1649_s13 = scalar_select %p142_p0, %s1552_s29, %s144_s12  }
  0x10   : > { %p1651_p4 = por %p152_p2, %p151_p1  ;;  %p1064_p6 = scmp.ge.s32.totalorder %s1556_s30, 1 }
  0x11   : > { %2043 = sst [smem:[#allocation24_spill]] %s1649_s13  ;;  %p231_p7 = scmp.lt.s32.totalorder %s1556_s30, 4 }
  0x12   : > { %s2044_s14 = scalar_select %p1651_p4, 1, 0 }
  0x13   : > { %p1660_p8 = por %p2035_p5, %p157_p3  ;;  %p1665_p10 = pnand %p1064_p6, %p231_p7 }
  0x14   : > { %s1558_s17 = smov [#allocation8]   ;;  %s1559_s20 = smov [#allocation4]  }
  0x15   : > { %s2045_s15 = scalar_select %p1660_p8, 1, 0 }
  0x16   : > { %s2046_s16 = scalar_select %p1665_p10, 1, 0 }
  0x17   : > { %p1259_p11 = pneg %p1665_p10  ;;  %s256_s18 = sshll.u32 %s1558_s17, 4  ;;  %s1671_s18 = int_to_ptr.vmem [resolvable:$true] %s256_s18 }
  0x18   : > { %s243_s21 = sshll.u32 %s1559_s20, 4  ;;  %s1560_s22 = smov [#allocation10]   ;;  %s1679_s21 = int_to_ptr.vmem [resolvable:$true] %s243_s21 }
  0x19   : > { %p1675_p12 = pnand %p1259_p11, %p2035_p5  ;;  %s1681_s23 = sshll.u32 %s1560_s22, 4  ;;  %s274_s23 = int_to_ptr.vmem [resolvable:$true] %s1681_s23 }
  0x1a   : > { %s1326_s26 = scalar_lea.hbm %s2028_s2, 2048 }
  0x1b   : > { %p1327_p13 = scmp.ne.s32.totalorder %s2028_s2, %s1326_s26  ;;  %p1691_p0 = pneg %p1675_p12 }
  0x1c   : > { %p1333_p3 = scmp.lt.u32.totalorder %s1326_s26, %s2028_s2 }
  0x1d   : > { %p1329_p1 = pnand %p1691_p0, %p1327_p13 }
  0x1f   : > { %p1330_p2 = pneg %p1329_p1 }
  0x21   : > { %p1335_p6 = pnand %p1333_p3, %p1330_p2 }
  0x23   : > { %1338 = shalt.err (!%p1335_p6)
}
  0x24   : > { %s1339_s22 = scalar_lea.vmem %s1671_s18, 2048  ;;  %p1347_p5 = scmp.lt.s32.totalorder %s1671_s18, %s1671_s18 }
  0x25   : > { %p1340_p7 = scmp.ne.s32.totalorder %s1671_s18, %s1339_s22  ;;  %p1348_p8 = scmp.lt.s32.totalorder %s1339_s22, %s1339_s22 }
  0x27   : > { %p1342_p11 = pnand %p1340_p7, %p1691_p0  ;;  %p1349_p13 = por %p1348_p8, %p1347_p5 }
  0x29   : > { %p1343_p9 = pneg %p1342_p11 }
  0x2b   : > { %p1350_p1 = pnand %p1349_p13, %p1343_p9 }
  0x2d   : > { %1353 = shalt.err (!%p1350_p1)
}
  0x2e   : > { %s1561_s24 = smov 128   ;;  %s1562_s25 = smov 8  }
  0x2f   : > { %1265 = dma.hbm_to_vmem [thread:$0]  (!%p1675_p12), %s2028_s2, 2048, %s1671_s18, [#allocation9], %s1561_s24, %s1561_s24, %s1562_s25  }
  0x30   : > { %s1354_s20 = scalar_lea.hbm %s2027_s1, 2048 }
  0x31   : > { %p1355_p5 = scmp.ne.s32.totalorder %s2027_s1, %s1354_s20  ;;  %p1361_p2 = scmp.lt.u32.totalorder %s1354_s20, %s2027_s1 }
  0x33   : > { %p1357_p8 = pnand %p1355_p5, %p1691_p0 }
  0x35   : > { %p1358_p9 = pneg %p1357_p8 }
  0x37   : > { %p1363_p3 = pnand %p1361_p2, %p1358_p9 }
  0x39   : > { %1366 = shalt.err (!%p1363_p3)
}
  0x3a   : > { %s1367_s18 = scalar_lea.vmem %s1679_s21, 2048  ;;  %p1375_p13 = scmp.lt.s32.totalorder %s1679_s21, %s1679_s21 }
  0x3b   : > { %p1368_p6 = scmp.ne.s32.totalorder %s1679_s21, %s1367_s18  ;;  %p1376_p1 = scmp.lt.s32.totalorder %s1367_s18, %s1367_s18 }
  0x3d   : > { %p1370_p7 = pnand %p1368_p6, %p1691_p0  ;;  %p1377_p5 = por %p1376_p1, %p1375_p13 }
  0x3f   : > { %p1371_p11 = pneg %p1370_p7 }
  0x41   : > { %p1378_p8 = pnand %p1377_p5, %p1371_p11 }
  0x43   : > { %1381 = shalt.err (!%p1378_p8)
}
  0x44   : > { %1262 = dma.hbm_to_vmem [thread:$0]  (!%p1675_p12), %s2027_s1, 2048, %s1679_s21, [#allocation5], %s1561_s24, %s1561_s24, %s1562_s25  }
  0x45   : > { %s1382_s27 = scalar_lea.hbm %s2030_s4, 16 }
  0x46   : > { %p1383_p9 = scmp.ne.s32.totalorder %s2030_s4, %s1382_s27  ;;  %p1389_p6 = scmp.lt.u32.totalorder %s1382_s27, %s2030_s4 }
  0x48   : > { %p1385_p2 = pnand %p1383_p9, %p1691_p0 }
  0x4a   : > { %p1386_p3 = pneg %p1385_p2 }
  0x4c   : > { %p1391_p7 = pnand %p1389_p6, %p1386_p3 }
  0x4e   : > { %1394 = shalt.err (!%p1391_p7)
}
  0x4f   : > { %s1395_s18 = scalar_lea.vmem %s274_s23, 16  ;;  %s1402_s21 = scalar_lea.vmem %s274_s23, 32 }
  0x50   : > { %p1396_p11 = scmp.ne.s32.totalorder %s274_s23, %s1395_s18  ;;  %p1403_p5 = scmp.lt.s32.totalorder %s274_s23, %s274_s23 }
  0x51   : > { %p1404_p8 = scmp.lt.s32.totalorder %s1402_s21, %s1395_s18 }
  0x52   : > { %p1398_p13 = pnand %p1396_p11, %p1691_p0 }
  0x53   : > { %p1405_p10 = por %p1404_p8, %p1403_p5 }
  0x54   : > { %p1399_p1 = pneg %p1398_p13 }
  0x56   : > { %p1406_p4 = pnand %p1405_p10, %p1399_p1 }
  0x58   : > { %1409 = shalt.err (!%p1406_p4)
}
  0x59   : > { %1268 = dma.hbm_to_vmem [thread:$0]  (!%p1675_p12), %s2030_s4, 16, %s274_s23, [#allocation9]  }
  0x5a   : > { %p1068_p9 = scmp.ge.s32.totalorder %s1556_s30, 3 }
  0x5b   : > { %p2049_p2 = scmp.ne.s32.totalorder (!%p1068_p9), %s2044_s14, 0 }
  0x5c   : > { %280 = sbr.rel (%p1068_p9) target bundleno = 134 (0x86), region = 32 }
  0x63   : > { %300 = sbr.rel (!%p2049_p2) target bundleno = 134 (0x86), region = 40  ;;  %s301_s12 = sand.u32 (%p2049_p2), 1, %s1552_s29  }
  0x64   : > { %s1070_s8 = sshll.u32 (%p2049_p2), %s1556_s30, 4  ;;  %s1069_s10 = sshll.u32 (%p2049_p2), %s301_s12, 7 }
  0x65   : > { %s307_s13 = ssub.s32 (%p2049_p2), 34, %s1070_s8  ;;  %s1762_s27 = scalar_lea.sflag (%p2049_p2), [#allocation12], %s301_s12 }
  0x66   : > { %p308_p10 = scmp.lt.s32.totalorder (%p2049_p2), %s307_s13, 16  ;;  %s305_s23 = scalar_lea.vmem (%p2049_p2), [#allocation11], %s1069_s10 }
  0x6a   : > { %s2064_s13 = smov (!%p308_p10, %s307_s13), 16 }
  0x6b   : > { %s1759_s26 = sshll.u32 %s2064_s13, 7 }
  0x6c   : > { %s312_s19 = ssub.s32 2048, %s1759_s26 }
  0x6d   : > { %313 = vsyncadd %s1762_s27, %s312_s19  ;;  %p1072_p4 = scmp.ne.s32.totalorder %s1759_s26, 0  ;;  %s1095_s14 = sshll.u32 %s1556_s30, 11 }
  0x6e   : > { %s1770_s20 = scalar_lea.hbm %s2031_s5, %s1095_s14  ;;  %s318_s22 = sshll.u32 %s305_s23, 4  ;;  %s1772_s22 = int_to_ptr.vmem [resolvable:$true] %s318_s22 }
  0x6f   : > { %s1410_s18 = scalar_lea.hbm %s1770_s20, %s1759_s26  ;;  %s1414_s30 = scalar_lea.hbm %s2031_s5, 4352 }
  0x70   : > { %p1411_p12 = scmp.ne.s32.totalorder %s1770_s20, %s1410_s18  ;;  %p1415_p6 = scmp.lt.u32.totalorder %s1770_s20, %s2031_s5 }
  0x71   : > { %p1416_p7 = scmp.lt.u32.totalorder %s1414_s30, %s1410_s18  ;;  %p1418_p13 = scmp.lt.u32.totalorder %s1410_s18, %s1770_s20 }
  0x72   : > { %p1412_p0 = pnand %p1411_p12, %p1072_p4 }
  0x73   : > { %p1417_p11 = por %p1416_p7, %p1415_p6 }
  0x74   : > { %p1413_p3 = pneg %p1412_p0 }
  0x75   : > { %p1419_p1 = por %p1418_p13, %p1417_p11 }
  0x77   : > { %p1420_p5 = pnand %p1419_p1, %p1413_p3 }
  0x79   : > { %1423 = shalt.err (!%p1420_p5)
}
  0x7a   : > { %s1424_s8 = scalar_lea.vmem %s1772_s22, %s1759_s26  ;;  %s1563_s10 = smov [#allocation11]  }
  0x7b   : > { %p1425_p8 = scmp.ne.s32.totalorder %s1772_s22, %s1424_s8  ;;  %s1428_s13 = sshll.u32 %s1563_s10, 4  ;;  %s1429_s13 = int_to_ptr.vmem [resolvable:$false] %s1428_s13 }
  0x7c   : > { %s1430_s19 = scalar_lea.vmem %s1429_s13, 4096  ;;  %p1431_p10 = scmp.lt.s32.totalorder %s1772_s22, %s1429_s13 }
  0x7d   : > { %p1426_p9 = pnand %p1425_p8, %p1072_p4  ;;  %p1432_p12 = scmp.lt.s32.totalorder %s1430_s19, %s1424_s8 }
  0x7f   : > { %p1427_p2 = pneg %p1426_p9  ;;  %p1433_p0 = por %p1432_p12, %p1431_p10 }
  0x81   : > { %p1434_p6 = pnand %p1433_p0, %p1427_p2 }
  0x83   : > { %1437 = shalt.err (!%p1434_p6)
}
  0x84   : > { %s1564_s23 = smov 128   ;;  %s1565_s14 = smov 8  }
  0x85   : > { %324 = dma.hbm_to_vmem [thread:$0]  (%p1072_p4), %s1770_s20, %s1759_s26, %s1772_s22, %s1762_s27, %s1564_s23, %s1564_s23, %s1565_s14  }
  0x86 PF: > { %p2050_p3 = scmp.ne.s32.totalorder %s2046_s16, 0 }
  0x87   : > { %p2051_p7 = scmp.eq.s32.totalorder (!%p2050_p3), %s1636_s9, 0 }
  0x88   : > { %330 = sbr.rel (%p2050_p3) target bundleno = 936 (0x3a8), region = 44 }
  0x8f   : > { %1519 = dma.done.wait (%p2051_p7), [#allocation5], 2048   ;;  %p2052_p11 = pmov %p2051_p7 }
  0x90   : > { %p2053_p13 = pmov %p2051_p7 }
  0x91   : > { %1521 = vsyncadd (%p2052_p11), [#allocation5], 4294965248 }
  0x92   : > { %1523 = dma.done.wait (%p2053_p13), [#allocation9], 2064   ;;  %p2054_p1 = pmov %p2051_p7 }
  0x93   : > { %s344_s26 = sand.u32 1, %s1548_s28   ;;  %p2055_p4 = scmp.ne.s32.totalorder %s2045_s15, 0 }
  0x94   : > { %1525 = vsyncadd (%p2054_p1), [#allocation9], 4294965232  ;;  %s1080_s27 = sshll.u32 %s344_s26, 7  ;;  %s345_s11 = scalar_lea.sflag [#allocation12], %s344_s26 }
  0x95   : > { %s1810_s17 = scalar_lea.vmem [#allocation11], %s1080_s27 }
  0x96   : > { %1527 = dma.done.wait (%p2055_p4), %s345_s11, 2048  }
  0x97   : > { %1529 = vsyncadd (%p2055_p4), %s345_s11, 4294965248  ;;  %s1081_s16 = sshll.u32 %s1636_s9, 4  ;;  %p2056_p8 = scmp.ne.s32.totalorder %s1636_s9, 0 }
  0x98   : > { %p390_p5 = scmp.lt.s32.totalorder %s1081_s16, 33  ;;  %v408_v0 = vld [vmem:[#allocation4] sm:$0xff] (!%p2056_p8)  ;;  %v409_v2 = vld [vmem:[#allocation4 + $0x8] sm:$0xff] (!%p2056_p8)  ;;  %v410_v5 = vld [vmem:[#allocation4 + $0x10] sm:$0xff] (!%p2056_p8) }
  0x99   : > { %407 = sbr.rel (%p2056_p8) target bundleno = 348 (0x15c), region = 64  ;;  %v424_v1 = vld [vmem:[#allocation8] sm:$0xff] (!%p2056_p8)  ;;  %v425_v4 = vld [vmem:[#allocation8 + $0x8] sm:$0xff] (!%p2056_p8)  ;;  %v426_v6 = vld [vmem:[#allocation8 + $0x10] sm:$0xff] (!%p2056_p8) }
  0x9a   : > { %s2066_s16 = smov (!%p390_p5, %s1081_s16), 33  ;;  %v440_v3 = vadd.f32 (!%p2056_p8), %v424_v1, %v408_v0  ;;  %v441_v7 = vadd.f32 (!%p2056_p8), %v425_v4, %v409_v2  ;;  %v442_v8 = vadd.f32 (!%p2056_p8), %v426_v6, %v410_v5  ;;  %v411_v9 = vld [vmem:[#allocation4 + $0x18] sm:$0xff] (!%p2056_p8)  ;;  %v412_v11 = vld [vmem:[#allocation4 + $0x20] sm:$0xff] (!%p2056_p8)  ;;  %v413_v15 = vld [vmem:[#allocation4 + $0x28] sm:$0xff] (!%p2056_p8)  ;;  %v1566_v4 = vmov (!%p2056_p8), 0.0  }
  0x9b   : > { %s1082_s20 = sshll.u32 %s2066_s16, 3  ;;  %v427_v10 = vld [vmem:[#allocation8 + $0x18] sm:$0xff] (!%p2056_p8)  ;;  %v428_v14 = vld [vmem:[#allocation8 + $0x20] sm:$0xff] (!%p2056_p8)  ;;  %v429_v16 = vld [vmem:[#allocation8 + $0x28] sm:$0xff] (!%p2056_p8)  ;;  %541 = vst [vmem:[#allocation2] sm:$0x1] (!%p2056_p8), %v1566_v4 }
  0x9c   : > { %s1820_s21 = scalar_lea.vmem %s2026_s0, %s1082_s20  ;;  %v456_v12 = vmul.f32 (!%p2056_p8), 0.5, %v440_v3  ;;  %v443_v13 = vadd.f32 (!%p2056_p8), %v427_v10, %v411_v9  ;;  %v457_v17 = vmul.f32 (!%p2056_p8), 0.5, %v441_v7  ;;  %v458_v18 = vmul.f32 (!%p2056_p8), 0.5, %v442_v8  ;;  %v414_v21 = vld [vmem:[#allocation4 + $0x30] sm:$0xff] (!%p2056_p8)  ;;  %v415_v23 = vld [vmem:[#allocation4 + $0x38] sm:$0xff] (!%p2056_p8)  ;;  %v416_v27 = vld [vmem:[#allocation4 + $0x40] sm:$0xff] (!%p2056_p8) }
  0x9d   : > { %v444_v19 = vadd.f32 (!%p2056_p8), %v428_v14, %v412_v11  ;;  %v445_v20 = vadd.f32 (!%p2056_p8), %v429_v16, %v413_v15  ;;  %v430_v22 = vld [vmem:[#allocation8 + $0x30] sm:$0xff] (!%p2056_p8)  ;;  %v431_v26 = vld [vmem:[#allocation8 + $0x38] sm:$0xff] (!%p2056_p8)  ;;  %v432_v28 = vld [vmem:[#allocation8 + $0x40] sm:$0xff] (!%p2056_p8) }
  0x9e   : > { %472 = vst [vmem:[#allocation14] sm:$0xff] (!%p2056_p8), %v456_v12  ;;  %488 = vxpose.xlu0.b32.start [1/16] (!%p2056_p8), %v456_v12, 128  ;;  %v459_v24 = vmul.f32 (!%p2056_p8), 0.5, %v443_v13  ;;  %v446_v25 = vadd.f32 (!%p2056_p8), %v430_v22, %v414_v21  ;;  %473 = vst [vmem:[#allocation14 + $0x8] sm:$0xff] (!%p2056_p8), %v457_v17  ;;  %v447_v31 = vadd.f32 (!%p2056_p8), %v431_v26, %v415_v23  ;;  %v417_v33 = vld [vmem:[#allocation4 + $0x48] sm:$0xff] (!%p2056_p8)  ;;  %v418_v35 = vld [vmem:[#allocation4 + $0x50] sm:$0xff] (!%p2056_p8) }
  0x9f   : > { %474 = vst [vmem:[#allocation14 + $0x10] sm:$0xff] (!%p2056_p8), %v458_v18  ;;  %v460_v29 = vmul.f32 (!%p2056_p8), 0.5, %v444_v19  ;;  %v461_v30 = vmul.f32 (!%p2056_p8), 0.5, %v445_v20  ;;  %v448_v32 = vadd.f32 (!%p2056_p8), %v432_v28, %v416_v27  ;;  %v433_v34 = vld [vmem:[#allocation8 + $0x48] sm:$0xff] (!%p2056_p8)  ;;  %v434_v38 = vld [vmem:[#allocation8 + $0x50] sm:$0xff] (!%p2056_p8)  ;;  %v419_v39 = vld [vmem:[#allocation4 + $0x58] sm:$0xff] (!%p2056_p8) }
  0xa0   : > { %475 = vst [vmem:[#allocation14 + $0x18] sm:$0xff] %v459_v24  ;;  %v462_v36 = vmul.f32 0.5, %v446_v25  ;;  %v449_v37 = vadd.f32 %v433_v34, %v417_v33  ;;  %v435_v40 = vld [vmem:[#allocation8 + $0x58] sm:$0xff]  ;;  %v463_v41 = vmul.f32 0.5, %v447_v31  ;;  %v450_v43 = vadd.f32 %v434_v38, %v418_v35  ;;  %v420_v45 = vld [vmem:[#allocation4 + $0x60] sm:$0xff]  ;;  %v421_v47 = vld [vmem:[#allocation4 + $0x68] sm:$0xff] }
  0xa1   : > { %476 = vst [vmem:[#allocation14 + $0x20] sm:$0xff] %v460_v29  ;;  %477 = vst [vmem:[#allocation14 + $0x28] sm:$0xff] %v461_v30  ;;  %v464_v42 = vmul.f32 0.5, %v448_v32  ;;  %v451_v44 = vadd.f32 %v435_v40, %v419_v39  ;;  %v436_v46 = vld [vmem:[#allocation8 + $0x60] sm:$0xff]  ;;  %v437_v50 = vld [vmem:[#allocation8 + $0x68] sm:$0xff] }
  0xa2   : > { %489 = vxpose.xlu0.b32.cont [2/16] %v457_v17, 128  ;;  %478 = vst [vmem:[#allocation14 + $0x30] sm:$0xff] %v462_v36  ;;  %v465_v48 = vmul.f32 0.5, %v449_v37  ;;  %v452_v49 = vadd.f32 %v436_v46, %v420_v45  ;;  %v422_v51 = vld [vmem:[#allocation4 + $0x70] sm:$0xff]  ;;  %479 = vst [vmem:[#allocation14 + $0x38] sm:$0xff] %v463_v41  ;;  %v466_v53 = vmul.f32 0.5, %v450_v43  ;;  %v453_v55 = vadd.f32 %v437_v50, %v421_v47  ;;  %v423_v57 = vld [vmem:[#allocation4 + $0x78] sm:$0xff] }
  0xa3   : > { %v438_v52 = vld [vmem:[#allocation8 + $0x70] sm:$0xff]  ;;  %480 = vst [vmem:[#allocation14 + $0x40] sm:$0xff] %v464_v42  ;;  %v467_v54 = vmul.f32 0.5, %v451_v44  ;;  %v439_v58 = vld [vmem:[#allocation8 + $0x78] sm:$0xff]  ;;  %v537_v1 = vld [vmem:[#allocation10] sm:$0x1] }
  0xa4   : > { %v454_v56 = vadd.f32 %v438_v52, %v422_v51  ;;  %481 = vst [vmem:[#allocation14 + $0x48] sm:$0xff] %v465_v48  ;;  %v468_v59 = vmul.f32 0.5, %v452_v49  ;;  %v455_v60 = vadd.f32 %v439_v58, %v423_v57  ;;  %482 = vst [vmem:[#allocation14 + $0x50] sm:$0xff] %v466_v53  ;;  %v469_v61 = vmul.f32 0.5, %v453_v55  ;;  %v536_v0 = vld [vmem:[%s2029_s3] sm:$0x1] }
  0xa5   : > { %483 = vst [vmem:[#allocation14 + $0x58] sm:$0xff] %v467_v54  ;;  %v538_v2 = vadd.f32 %v537_v1, %v536_v0 }
  0xa6   : > { %v470_v62 = vmul.f32 0.5, %v454_v56  ;;  %490 = vxpose.xlu0.b32.cont [3/16] %v458_v18, 128  ;;  %484 = vst [vmem:[#allocation14 + $0x60] sm:$0xff] %v468_v59  ;;  %v471_v63 = vmul.f32 0.5, %v455_v60  ;;  %485 = vst [vmem:[#allocation14 + $0x68] sm:$0xff] %v469_v61 }
  0xa7   : > { %v539_v3 = vmul.f32 0.5, %v538_v2 }
  0xa8   : > { %486 = vst [vmem:[#allocation14 + $0x70] sm:$0xff] %v470_v62  ;;  %487 = vst [vmem:[#allocation14 + $0x78] sm:$0xff] %v471_v63 }
  0xa9   : > { %540 = vst [vmem:[#allocation15] sm:$0x1] %v539_v3 }
  0xaa   : > { %491 = vxpose.xlu0.b32.cont [4/16] %v459_v24, 128 }
  0xae   : > { %492 = vxpose.xlu0.b32.cont [5/16] %v460_v29, 128 }
  0xb2   : > { %493 = vxpose.xlu0.b32.cont [6/16] %v461_v30, 128 }
  0xb6   : > { %494 = vxpose.xlu0.b32.cont [7/16] %v462_v36, 128 }
  0xba   : > { %495 = vxpose.xlu0.b32.cont [8/16] %v463_v41, 128 }
  0xbe   : > { %496 = vxpose.xlu0.b32.cont [9/16] %v464_v42, 128 }
  0xc2   : > { %497 = vxpose.xlu0.b32.cont [10/16] %v465_v48, 128 }
  0xc6   : > { %498 = vxpose.xlu0.b32.cont [11/16] %v466_v53, 128 }
  0xca   : > { %499 = vxpose.xlu0.b32.cont [12/16] %v467_v54, 128 }
  0xce   : > { %500 = vxpose.xlu0.b32.cont [13/16] %v468_v59, 128 }
  0xd2   : > { %501 = vxpose.xlu0.b32.cont [14/16] %v469_v61, 128 }
  0xd6   : > { %502 = vxpose.xlu0.b32.cont [15/16] %v470_v62, 128 }
  0xda   : > { %503 = vxpose.xlu0.b32.end [16/16] %v471_v63, 128 }
 0x11e   : > { %v504_v5 = vpop.trf.xlu0 }
 0x11f   : > { %520 = vst [vmem:[#allocation3] sm:$0xff] %v504_v5 }
 0x122   : > { %v505_v6 = vpop.trf.xlu0 }
 0x123   : > { %521 = vst [vmem:[#allocation3 + $0x8] sm:$0xff] %v505_v6 }
 0x126   : > { %v506_v7 = vpop.trf.xlu0 }
 0x127   : > { %522 = vst [vmem:[#allocation3 + $0x10] sm:$0xff] %v506_v7 }
 0x12a   : > { %v507_v8 = vpop.trf.xlu0 }
 0x12b   : > { %523 = vst [vmem:[#allocation3 + $0x18] sm:$0xff] %v507_v8 }
 0x12e   : > { %v508_v9 = vpop.trf.xlu0 }
 0x12f   : > { %524 = vst [vmem:[#allocation3 + $0x20] sm:$0xff] %v508_v9 }
 0x132   : > { %v509_v10 = vpop.trf.xlu0 }
 0x133   : > { %525 = vst [vmem:[#allocation3 + $0x28] sm:$0xff] %v509_v10 }
 0x136   : > { %v510_v11 = vpop.trf.xlu0 }
 0x137   : > { %526 = vst [vmem:[#allocation3 + $0x30] sm:$0xff] %v510_v11 }
 0x13a   : > { %v511_v12 = vpop.trf.xlu0 }
 0x13b   : > { %527 = vst [vmem:[#allocation3 + $0x38] sm:$0xff] %v511_v12 }
 0x13e   : > { %v512_v13 = vpop.trf.xlu0 }
 0x13f   : > { %528 = vst [vmem:[#allocation3 + $0x40] sm:$0xff] %v512_v13 }
 0x142   : > { %v513_v14 = vpop.trf.xlu0 }
 0x143   : > { %529 = vst [vmem:[#allocation3 + $0x48] sm:$0xff] %v513_v14 }
 0x146   : > { %v514_v15 = vpop.trf.xlu0 }
 0x147   : > { %530 = vst [vmem:[#allocation3 + $0x50] sm:$0xff] %v514_v15 }
 0x14a   : > { %v515_v16 = vpop.trf.xlu0 }
 0x14b   : > { %531 = vst [vmem:[#allocation3 + $0x58] sm:$0xff] %v515_v16 }
 0x14e   : > { %v516_v17 = vpop.trf.xlu0 }
 0x14f   : > { %532 = vst [vmem:[#allocation3 + $0x60] sm:$0xff] %v516_v17 }
 0x152   : > { %v517_v18 = vpop.trf.xlu0 }
 0x153   : > { %533 = vst [vmem:[#allocation3 + $0x68] sm:$0xff] %v517_v18 }
 0x156   : > { %v518_v19 = vpop.trf.xlu0 }
 0x157   : > { %534 = vst [vmem:[#allocation3 + $0x70] sm:$0xff] %v518_v19 }
 0x15a   : > { %v519_v20 = vpop.trf.xlu0 }
 0x15b   : > { %535 = vst [vmem:[#allocation3 + $0x78] sm:$0xff] %v519_v20 }
 0x15c PF: > { %v558_v21 = vld [vmem:[#allocation3] sm:$0xff]  ;;  %v559_v22 = vld [vmem:[#allocation3 + $0x8] sm:$0xff]  ;;  %v560_v23 = vld [vmem:[#allocation3 + $0x10] sm:$0xff]  ;;  %v775_v61 = vlaneseq  ;;  %s1085_s30 = sshll.u32 %s1636_s9, 7  ;;  %p1086_p9 = scmp.ne.s32.totalorder %s1636_s9, 2 }
 0x15d   : > { %v1184_v24 = vpack.c.bf16 %v559_v22, %v558_v21  ;;  %v561_v25 = vld [vmem:[#allocation3 + $0x18] sm:$0xff]  ;;  %v562_v27 = vld [vmem:[#allocation3 + $0x20] sm:$0xff]  ;;  %v563_v28 = vld [vmem:[#allocation3 + $0x28] sm:$0xff]  ;;  %v1847_v0 = vstv %s1085_s30 }
 0x15e   : > { %v1188_v26 = vpack.c.bf16 %v561_v25, %v560_v23  ;;  %v1192_v29 = vpack.c.bf16 %v563_v28, %v562_v27  ;;  %v542_v30 = vld [vmem:[%s1820_s21] sm:$0xff]  ;;  %v564_v31 = vld [vmem:[#allocation3 + $0x30] sm:$0xff]  ;;  %v567_v36 = vld [vmem:[#allocation3 + $0x48] sm:$0xff]  ;;  %v1843_v62 = vshrl.u32 %v775_v61, 7 }
 0x15f   : > { %1185 = vmatprep.subr.bf16.mxu0 %v1184_v24  ;;  %1216 = vmatprep.subr.bf16.mxu1 %v1184_v24  ;;  %v565_v32 = vld [vmem:[#allocation3 + $0x38] sm:$0xff]  ;;  %v566_v35 = vld [vmem:[#allocation3 + $0x40] sm:$0xff]  ;;  %v568_v38 = vld [vmem:[#allocation3 + $0x50] sm:$0xff] }
 0x160   : > { %1187 = vmatpush3.bf16.msra.mxu0 %v1184_v24  ;;  %1224 = vmatpush3.bf16.msra.mxu1 %v1184_v24  ;;  %v550_v33 = vld [vmem:[%s1820_s21 + $0x40] sm:$0xff]  ;;  %v1196_v34 = vpack.c.bf16 %v565_v32, %v564_v31  ;;  %v1200_v37 = vpack.c.bf16 %v567_v36, %v566_v35  ;;  %v571_v42 = vld [vmem:[#allocation3 + $0x68] sm:$0xff]  ;;  %v572_v44 = vld [vmem:[#allocation3 + $0x70] sm:$0xff]  ;;  %v777_v63 = vadd.s32 8, %v1843_v62  ;;  %v793_v5 = vadd.s32 %v1847_v0, %v1843_v62 }
 0x161   : > { %1189 = vmatprep.subr.bf16.mxu0 %v1188_v26  ;;  %1217 = vmatprep.subr.bf16.mxu1 %v1188_v26  ;;  %v569_v39 = vld [vmem:[#allocation3 + $0x58] sm:$0xff]  ;;  %v570_v41 = vld [vmem:[#allocation3 + $0x60] sm:$0xff]  ;;  %v544_v49 = vld [vmem:[%s1820_s21 + $0x10] sm:$0xff]  ;;  %v779_v6 = vadd.s32 24, %v1843_v62  ;;  %v778_v7 = vadd.s32 16, %v1843_v62  ;;  %v781_v12 = vadd.s32 40, %v1843_v62 }
 0x162   : > { %1160 = vmatprep.mubr.f32.mxu0 %v542_v30  ;;  %1172 = vmatprep.mubr.f32.mxu1 %v550_v33  ;;  %v1204_v40 = vpack.c.bf16 %v569_v39, %v568_v38  ;;  %v1208_v43 = vpack.c.bf16 %v571_v42, %v570_v41  ;;  %v573_v45 = vld [vmem:[#allocation3 + $0x78] sm:$0xff]  ;;  %v543_v47 = vld [vmem:[%s1820_s21 + $0x8] sm:$0xff]  ;;  %v552_v50 = vld [vmem:[%s1820_s21 + $0x50] sm:$0xff]  ;;  %v794_v2 = vadd.s32 %v1847_v0, %v777_v63  ;;  %v780_v13 = vadd.s32 32, %v1843_v62 }
 0x163   : > { %v1212_v46 = vpack.c.bf16 %v573_v45, %v572_v44  ;;  %v551_v48 = vld [vmem:[%s1820_s21 + $0x48] sm:$0xff]  ;;  %v545_v51 = vld [vmem:[%s1820_s21 + $0x18] sm:$0xff]  ;;  %v546_v53 = vld [vmem:[%s1820_s21 + $0x20] sm:$0xff]  ;;  %v783_v16 = vadd.s32 56, %v1843_v62  ;;  %v782_v17 = vadd.s32 48, %v1843_v62  ;;  %vm809_vm1 = vcmp.lt.s32.totalorder %v793_v5, 270 }
 0x164   : > { %1191 = vmatpush3.bf16.msra.mxu0 %v1188_v26  ;;  %1225 = vmatpush3.bf16.msra.mxu1 %v1188_v26  ;;  %v553_v52 = vld [vmem:[%s1820_s21 + $0x58] sm:$0xff]  ;;  %v554_v54 = vld [vmem:[%s1820_s21 + $0x60] sm:$0xff]  ;;  %v547_v55 = vld [vmem:[%s1820_s21 + $0x28] sm:$0xff]  ;;  %vm810_vm0 = vcmp.lt.s32.totalorder %v794_v2, 270  ;;  %v796_v22 = vadd.s32 %v1847_v0, %v779_v6  ;;  %v795_v23 = vadd.s32 %v1847_v0, %v778_v7  ;;  %v797_v30 = vadd.s32 %v1847_v0, %v780_v13 }
 0x165   : > { %1193 = vmatprep.subr.bf16.mxu0 %v1192_v29  ;;  %1218 = vmatprep.subr.bf16.mxu1 %v1192_v29  ;;  %v555_v56 = vld [vmem:[%s1820_s21 + $0x68] sm:$0xff]  ;;  %v548_v57 = vld [vmem:[%s1820_s21 + $0x30] sm:$0xff]  ;;  %v549_v59 = vld [vmem:[%s1820_s21 + $0x38] sm:$0xff]  ;;  %v1880_v35 = vadd.s32 %v1847_v0, %v782_v17  ;;  %v785_v38 = vadd.s32 72, %v1843_v62  ;;  %v784_v39 = vadd.s32 64, %v1843_v62  ;;  %v786_v2 = vadd.s32 80, %v1843_v62 }
 0x166   : > { %v556_v58 = vld [vmem:[%s1820_s21 + $0x70] sm:$0xff]  ;;  %v557_v60 = vld [vmem:[%s1820_s21 + $0x78] sm:$0xff]  ;;  %v1849_v1 = vld [vmem:[#allocation15] ss:$0 sm:$0xff]  ;;  %vm812_vm2 = vcmp.lt.s32.totalorder %v796_v22, 270  ;;  %vm811_vm3 = vcmp.lt.s32.totalorder %v795_v23, 270 }
 0x167   : > { %v727_v4 = vld [vmem:[%s1810_s17 + $0x8] sm:$0xff]  ;;  %v726_v11 = vld [vmem:[%s1810_s17] sm:$0xff]  ;;  %v729_v21 = vld [vmem:[%s1810_s17 + $0x18] sm:$0xff]  ;;  %vm813_vm5 = vcmp.lt.s32.totalorder %v797_v30, 270  ;;  %vm815_vm7 = vcmp.lt.s32.totalorder %v1880_v35, 270 }
 0x168   : > { %1195 = vmatpush3.bf16.msra.mxu0 %v1192_v29  ;;  %1226 = vmatpush3.bf16.msra.mxu1 %v1192_v29  ;;  %v728_v28 = vld [vmem:[%s1810_s17 + $0x10] sm:$0xff]  ;;  %v1872_v29 = vadd.s32 %v1847_v0, %v781_v12  ;;  %v733_v61 = vld [vmem:[%s1810_s17 + $0x38] sm:$0xff] }
 0x169   : > { %1197 = vmatprep.subr.bf16.mxu0 %v1196_v34  ;;  %1219 = vmatprep.subr.bf16.mxu1 %v1196_v34  ;;  %v732_v7 = vld [vmem:[%s1810_s17 + $0x30] sm:$0xff] }
 0x16a   : > { %vm814_vm4 = vcmp.lt.s32.totalorder %v1872_v29, 270 }
 0x16c   : > { %1199 = vmatpush3.bf16.msra.mxu0 %v1196_v34  ;;  %1227 = vmatpush3.bf16.msra.mxu1 %v1196_v34  ;;  %v1877_v34 = vadd.s32 %v1847_v0, %v783_v16 }
 0x16d   : > { %1201 = vmatprep.subr.bf16.mxu0 %v1200_v37  ;;  %1220 = vmatprep.subr.bf16.mxu1 %v1200_v37 }
 0x16e   : > { %vm816_vm6 = vcmp.lt.s32.totalorder %v1877_v34, 270 }
 0x170   : > { %1203 = vmatpush3.bf16.msra.mxu0 %v1200_v37  ;;  %1228 = vmatpush3.bf16.msra.mxu1 %v1200_v37 }
 0x171   : > { %1205 = vmatprep.subr.bf16.mxu0 %v1204_v40  ;;  %1221 = vmatprep.subr.bf16.mxu1 %v1204_v40 }
 0x174   : > { %1207 = vmatpush3.bf16.msra.mxu0 %v1204_v40  ;;  %1229 = vmatpush3.bf16.msra.mxu1 %v1204_v40 }
 0x175   : > { %1209 = vmatprep.subr.bf16.mxu0 %v1208_v43  ;;  %1222 = vmatprep.subr.bf16.mxu1 %v1208_v43 }
 0x178   : > { %1211 = vmatpush3.bf16.msra.mxu0 %v1208_v43  ;;  %1230 = vmatpush3.bf16.msra.mxu1 %v1208_v43  ;;  %v731_v43 = vld [vmem:[%s1810_s17 + $0x28] sm:$0xff] }
 0x179   : > { %1213 = vmatprep.subr.bf16.mxu0 %v1212_v46  ;;  %1223 = vmatprep.subr.bf16.mxu1 %v1212_v46 }
 0x17c   : > { %1215 = vmatpush3.bf16.msra.mxu0 %v1212_v46  ;;  %1231 = vmatpush3.bf16.msra.mxu1 %v1212_v46 }
 0x17f   : > { %1161 = vmatmul.mubr.f32.vlgmr.msra.gmra.mrb[0].mxu0 %v543_v47  ;;  %1173 = vmatmul.mubr.f32.vlgmr.msra.gmra.mrb[0].mxu1 %v551_v48  ;;  %v730_v48 = vld [vmem:[%s1810_s17 + $0x20] sm:$0xff] }
 0x180   : > { %1163 = vmatprep.mubr.f32.mxu0 %v544_v49  ;;  %1175 = vmatprep.mubr.f32.mxu1 %v552_v50 }
 0x183   : > { %1164 = vmatmul.mubr.f32.gmra.mrb[2].mxu0 %v545_v51  ;;  %1176 = vmatmul.mubr.f32.gmra.mrb[2].mxu1 %v553_v52 }
 0x184   : > { %1166 = vmatprep.mubr.f32.mxu0 %v546_v53  ;;  %1178 = vmatprep.mubr.f32.mxu1 %v554_v54  ;;  %v734_v54 = vld [vmem:[%s1810_s17 + $0x40] sm:$0xff] }
 0x187   : > { %1167 = vmatmul.mubr.f32.gmra.mrb[4].mxu0 %v547_v55  ;;  %1179 = vmatmul.mubr.f32.gmra.mrb[4].mxu1 %v555_v56  ;;  %v1898_v56 = vadd.s32 %v1847_v0, %v785_v38 }
 0x188   : > { %1169 = vmatprep.mubr.f32.mxu0 %v548_v57  ;;  %1181 = vmatprep.mubr.f32.mxu1 %v556_v58  ;;  %v801_v57 = vadd.s32 %v1847_v0, %v784_v39  ;;  %v738_v39 = vld [vmem:[%s1810_s17 + $0x60] sm:$0xff] }
 0x189   : > { %vm818_vm9 = vcmp.lt.s32.totalorder %v1898_v56, 270 }
 0x18a   : > { %vm817_vm8 = vcmp.lt.s32.totalorder %v801_v57, 270 }
 0x18b   : > { %1170 = vmatmul.mubr.f32.gmra.mrb[6].mxu0 %v549_v59  ;;  %1182 = vmatmul.mubr.f32.gmra.mrb[6].mxu1 %v557_v60 }
 0x252   : > { %v1162_v3 = vpop.f32.mrb[0].mxu0  ;;  %v1174_v8 = vpop.f32.mrb[0].mxu1 }
 0x253   : > { %v653_v9 = vadd.f32 %v1162_v3, %v1849_v1  ;;  %v647_v10 = vpop.f32.mrb[1].mxu0  ;;  %v687_v14 = vpop.f32.mrb[1].mxu1  ;;  %v693_v63 = vadd.f32 %v1174_v8, %v1849_v1  ;;  %v736_v8 = vld [vmem:[%s1810_s17 + $0x50] sm:$0xff] }
 0x254   : > { %v648_v15 = vadd.f32 %v1849_v1, %v647_v10  ;;  %v688_v49 = vadd.f32 %v1849_v1, %v687_v14 }
 0x255   : > { %v743_v18 = vsub.f32 %v653_v9, %v727_v4  ;;  %v735_v9 = vld [vmem:[%s1810_s17 + $0x48] sm:$0xff] }
 0x256   : > { %v742_v19 = vsub.f32 %v648_v15, %v726_v11  ;;  %v1165_v20 = vpop.f32.mrb[2].mxu0  ;;  %v1867_v24 = vpop.f32.mrb[2].mxu1  ;;  %v750_v10 = vsub.f32 %v688_v49, %v734_v54  ;;  %v751_v23 = vsub.f32 %v693_v63, %v735_v9  ;;  %v790_v54 = vadd.s32 112, %v1843_v62 }
 0x257   : > { %v759_v25 = vmul.f32 %v743_v18, %v743_v18  ;;  %v663_v26 = vadd.f32 %v1165_v20, %v1849_v1  ;;  %v657_v27 = vpop.f32.mrb[3].mxu0  ;;  %v697_v31 = vpop.f32.mrb[3].mxu1 }
 0x258   : > { %v758_v32 = vmul.f32 %v742_v19, %v742_v19  ;;  %v658_v33 = vadd.f32 %v1849_v1, %v657_v27  ;;  %v698_v11 = vadd.f32 %v1849_v1, %v697_v31  ;;  %v787_v19 = vadd.s32 88, %v1843_v62 }
 0x259   : > { %v858_v36 = vsel %vm810_vm0, %v759_v25, 0.0  ;;  %v745_v37 = vsub.f32 %v663_v26, %v729_v21  ;;  %v803_v25 = vadd.s32 %v1847_v0, %v786_v2  ;;  %v766_v26 = vmul.f32 %v750_v10, %v750_v10 }
 0x25a   : > { %v857_v40 = vsel %vm809_vm1, %v758_v32, 0.0  ;;  %v744_v41 = vsub.f32 %v658_v33, %v728_v28  ;;  %v1168_v42 = vpop.f32.mrb[4].mxu0  ;;  %v1887_v44 = vpop.f32.mrb[4].mxu1  ;;  %v703_v27 = vadd.f32 %v1867_v24, %v1849_v1  ;;  %v752_v28 = vsub.f32 %v698_v11, %v736_v8 }
 0x25b   : > { %v874_v45 = vadd.f32 %v858_v36, %v857_v40  ;;  %v673_v46 = vadd.f32 %v1168_v42, %v1849_v1  ;;  %v667_v47 = vpop.f32.mrb[5].mxu0  ;;  %v707_v50 = vpop.f32.mrb[5].mxu1  ;;  %v761_v51 = vmul.f32 %v745_v37, %v745_v37  ;;  %v737_v36 = vld [vmem:[%s1810_s17 + $0x58] sm:$0xff]  ;;  %v804_v38 = vadd.s32 %v1847_v0, %v787_v19 }
 0x25c   : > { %v760_v52 = vmul.f32 %v744_v41, %v744_v41  ;;  %v668_v53 = vadd.f32 %v1849_v1, %v667_v47  ;;  %v708_v30 = vadd.f32 %v1849_v1, %v707_v50  ;;  %v788_v40 = vadd.s32 96, %v1843_v62 }
 0x25d   : > { %v747_v55 = vsub.f32 %v673_v46, %v731_v43  ;;  %v860_v13 = vsel %vm812_vm2, %v761_v51, 0.0  ;;  %v767_v29 = vmul.f32 %v751_v23, %v751_v23  ;;  %vm819_vm10 = vcmp.lt.s32.totalorder %v803_v25, 270  ;;  %v739_v51 = vld [vmem:[%s1810_s17 + $0x68] sm:$0xff] }
 0x25e   : > { %v859_v58 = vsel %vm811_vm3, %v760_v52, 0.0  ;;  %v746_v59 = vsub.f32 %v668_v53, %v730_v48  ;;  %v1171_v60 = vpop.f32.mrb[6].mxu0  ;;  %v1183_v3 = vpop.f32.mrb[6].mxu1  ;;  %v789_v41 = vadd.s32 104, %v1843_v62  ;;  %v865_v43 = vsel %vm817_vm8, %v766_v26, 0.0  ;;  %v740_v53 = vld [vmem:[%s1810_s17 + $0x70] sm:$0xff] }
 0x25f   : > { %v875_v4 = vadd.f32 %v874_v45, %v859_v58  ;;  %v683_v5 = vadd.f32 %v1171_v60, %v1849_v1  ;;  %v677_v6 = vpop.f32.mrb[7].mxu0  ;;  %v717_v12 = vpop.f32.mrb[7].mxu1  ;;  %v763_v14 = vmul.f32 %v747_v55, %v747_v55  ;;  %v753_v45 = vsub.f32 %v703_v27, %v737_v36 }
 0x260   : > { %v762_v15 = vmul.f32 %v746_v59, %v746_v59  ;;  %v678_v16 = vadd.f32 %v1849_v1, %v677_v6  ;;  %v768_v46 = vmul.f32 %v752_v28, %v752_v28  ;;  %v713_v48 = vadd.f32 %v1887_v44, %v1849_v1 }
 0x261   : > { %v876_v17 = vadd.f32 %v875_v4, %v860_v13  ;;  %v749_v18 = vsub.f32 %v683_v5, %v733_v61  ;;  %v862_v31 = vsel %vm814_vm4, %v763_v14, 0.0  ;;  %v754_v49 = vsub.f32 %v708_v30, %v738_v39  ;;  %v741_v4 = vld [vmem:[%s1810_s17 + $0x78] sm:$0xff] }
 0x262   : > { %v861_v20 = vsel %vm813_vm5, %v762_v15, 0.0  ;;  %v748_v21 = vsub.f32 %v678_v16, %v732_v7  ;;  %v718_v35 = vadd.f32 %v1849_v1, %v717_v12  ;;  %v805_v52 = vadd.s32 %v1847_v0, %v788_v40 }
 0x263   : > { %v877_v22 = vadd.f32 %v876_v17, %v861_v20  ;;  %v765_v32 = vmul.f32 %v749_v18, %v749_v18  ;;  %vm820_vm11 = vcmp.lt.s32.totalorder %v804_v38, 270  ;;  %v806_v55 = vadd.s32 %v1847_v0, %v789_v41 }
 0x264   : > { %v764_v33 = vmul.f32 %v748_v21, %v748_v21  ;;  %v866_v34 = vsel %vm818_vm9, %v767_v29, 0.0  ;;  %v769_v58 = vmul.f32 %v753_v45, %v753_v45  ;;  %v867_v44 = vsel %vm819_vm10, %v768_v46, 0.0 }
 0x265   : > { %v878_v37 = vadd.f32 %v877_v22, %v862_v31  ;;  %v864_v47 = vsel %vm816_vm6, %v765_v32, 0.0  ;;  %v755_v59 = vsub.f32 %v713_v48, %v739_v51  ;;  %v770_v60 = vmul.f32 %v754_v49, %v754_v49  ;;  %v873_v22 = vld [vmem:[#allocation2] sm:$0x1] }
 0x266   : > { %v863_v24 = vsel %vm815_vm7, %v764_v33, 0.0  ;;  %v723_v61 = vadd.f32 %v1183_v3, %v1849_v1  ;;  %v756_v63 = vsub.f32 %v718_v35, %v740_v53  ;;  %vm821_vm12 = vcmp.lt.s32.totalorder %v805_v52, 270 }
 0x267   : > { %v879_v42 = vadd.f32 %v878_v37, %v863_v24  ;;  %v791_v5 = vadd.s32 120, %v1843_v62  ;;  %v807_v6 = vadd.s32 %v1847_v0, %v790_v54  ;;  %v868_v7 = vsel %vm820_vm11, %v769_v58, 0.0 }
 0x268   : > { %v771_v56 = vmul.f32 %v755_v59, %v755_v59  ;;  %v869_v10 = vsel %vm821_vm12, %v770_v60, 0.0  ;;  %v757_v11 = vsub.f32 %v723_v61, %v741_v4  ;;  %v772_v12 = vmul.f32 %v756_v63, %v756_v63 }
 0x269   : > { %v880_v50 = vadd.f32 %v879_v42, %v864_v47  ;;  %vm822_vm13 = vcmp.lt.s32.totalorder %v806_v55, 270  ;;  %v808_v14 = vadd.s32 %v1847_v0, %v791_v5  ;;  %vm823_vm14 = vcmp.lt.s32.totalorder %v807_v6, 270 }
 0x26a   : > { %v870_v3 = vsel %vm822_vm13, %v771_v56, 0.0  ;;  %v773_v15 = vmul.f32 %v757_v11, %v757_v11  ;;  %v871_v16 = vsel %vm823_vm14, %v772_v12, 0.0  ;;  %vm902_vm0 = vcmask (!%p1086_p9), 1040384  }
 0x26b   : > { %v881_v57 = vadd.f32 %v880_v50, %v865_v43  ;;  %vm824_vm15 = vcmp.lt.s32.totalorder %v808_v14, 270 }
 0x26c   : > { %v872_v17 = vsel %vm824_vm15, %v773_v15, 0.0 }
 0x26d   : > { %v882_v2 = vadd.f32 %v881_v57, %v866_v34 }
 0x26f   : > { %v883_v9 = vadd.f32 %v882_v2, %v867_v44 }
 0x271   : > { %v884_v13 = vadd.f32 %v883_v9, %v868_v7 }
 0x273   : > { %v885_v1 = vadd.f32 %v884_v13, %v869_v10 }
 0x275   : > { %v886_v8 = vadd.f32 %v885_v1, %v870_v3 }
 0x277   : > { %v887_v62 = vadd.f32 %v886_v8, %v871_v16 }
 0x279   : > { %v888_v18 = vadd.f32 %v887_v62, %v872_v17 }
 0x27b   : > { %v889_v19 = vrot.slane %v888_v18, 4 }
 0x27d   : > { %v890_v20 = vadd.f32 %v889_v19, %v888_v18 }
 0x27f   : > { %v891_v21 = vrot.slane %v890_v20, 2 }
 0x281   : > { %v892_v23 = vadd.f32 %v891_v21, %v890_v20 }
 0x283   : > { %v893_v25 = vrot.slane %v892_v23, 1  ;;  %900 = sbr.rel (%p1086_p9) target bundleno = 865 (0x361), region = 68 }
 0x285   : > { %v894_v26 = vadd.f32 %v893_v25, %v892_v23 }
 0x287   : > { %v895_v27 = vadd.f32 %v894_v26, %v873_v22 }
 0x289   : > { %896 = vst [vmem:[#allocation2] sm:$0x1] %v895_v27 }
 0x290   : > { %v901_v0 = vld [vmem:[#allocation2] sm:$0x1] }
 0x291   : > { %v903_v28 = vsel %vm902_vm0, %v901_v0, 0.0 }
 0x292   : > { %904 = vadd.xlane.f32.xlu0 %v903_v28 }
 0x31f   : > { %v905_v31 = vpop.xlane.xlu0 %904 }
 0x320   : > { %v906_v32 = vrot.slane %v905_v31, 4 }
 0x322   : > { %v907_v33 = vadd.f32 %v906_v32, %v905_v31 }
 0x324   : > { %v908_v36 = vrot.slane %v907_v33, 2 }
 0x326   : > { %v909_v30 = vadd.f32 %v908_v36, %v907_v33 }
 0x328   : > { %v910_v37 = vrot.slane %v909_v30, 1 }
 0x32a   : > { %v911_v38 = vadd.f32 %v910_v37, %v909_v30 }
 0x32c   : > { %1232 = vpush %v911_v38 }
 0x35d   : > { %s1233_s25 = spop %1232 }
 0x35e   : > { %s913_s12 = smul.f32 2.8935185e-05, %s1233_s25 }
 0x360   : > { %915 = sst [smem:[#allocation13]] %s913_s12 }
 0x361 PF: > { %p1275_p2 = scmp.eq.s32.totalorder %s1636_s9, 2  ;;  %s1438_s13 = scalar_lea.hbm %s2032_s6, 16 }
 0x362   : > { %p1439_p10 = scmp.ne.s32.totalorder %s2032_s6, %s1438_s13  ;;  %p1444_p6 = scmp.lt.u32.totalorder %s1438_s13, %s2032_s6 }
 0x364   : > { %p1440_p12 = pnand %p1439_p10, %p1275_p2 }
 0x366   : > { %p1441_p0 = pneg %p1440_p12 }
 0x368   : > { %p1446_p3 = pnand %p1444_p6, %p1441_p0 }
 0x36a   : > { %1449 = shalt.err (!%p1446_p3)
}
 0x36b   : > { %s1567_s27 = smov [#allocation13]   ;;  %s1568_s16 = smov [#allocation14]  }
 0x36c   : > { %1248 = dma.smem_to_hbm (%p1275_p2), %s1567_s27, 16, %s2032_s6, [#allocation7]  }
 0x36d   : > { %s931_s20 = sshll.u32 %s1568_s16, 4  ;;  %s932_s20 = int_to_ptr.vmem [resolvable:$true] %s931_s20 }
 0x36e   : > { %s1450_s22 = scalar_lea.vmem %s932_s20, 2048  ;;  %p1457_p1 = scmp.lt.s32.totalorder %s932_s20, %s932_s20 }
 0x36f   : > { %p1451_p7 = scmp.ne.s32.totalorder %s932_s20, %s1450_s22  ;;  %p1458_p4 = scmp.lt.s32.totalorder %s1450_s22, %s1450_s22 }
 0x371   : > { %p1452_p11 = pnand %p1451_p7, %p1275_p2  ;;  %p1459_p5 = por %p1458_p4, %p1457_p1 }
 0x373   : > { %p1453_p13 = pneg %p1452_p11 }
 0x375   : > { %p1460_p8 = pnand %p1459_p5, %p1453_p13 }
 0x377   : > { %1463 = shalt.err (!%p1460_p8)
}
 0x378   : > { %s1464_s15 = scalar_lea.hbm %s2033_s7, 2048 }
 0x379   : > { %p1465_p9 = scmp.ne.s32.totalorder %s2033_s7, %s1464_s15  ;;  %p1470_p0 = scmp.lt.u32.totalorder %s1464_s15, %s2033_s7 }
 0x37b   : > { %p1466_p10 = pnand %p1465_p9, %p1275_p2 }
 0x37d   : > { %p1467_p12 = pneg %p1466_p10 }
 0x37f   : > { %p1472_p6 = pnand %p1470_p0, %p1467_p12 }
 0x381   : > { %1475 = shalt.err (!%p1472_p6)
}
 0x382   : > { %s1569_s8 = smov 128   ;;  %s1570_s10 = smov 8  }
 0x383   : > { %1250 = dma.vmem_to_hbm [thread:$0]  (%p1275_p2), %s932_s20, 2048, %s2033_s7, [#allocation6], %s1569_s8, %s1569_s8, %s1570_s10  }
 0x384   : > { %s1571_s23 = smov [#allocation15]  }
 0x385   : > { %s945_s14 = sshll.u32 %s1571_s23, 4  ;;  %s946_s14 = int_to_ptr.vmem [resolvable:$true] %s945_s14 }
 0x386   : > { %s1476_s26 = scalar_lea.vmem %s946_s14, 16  ;;  %s1482_s27 = scalar_lea.vmem %s946_s14, 32 }
 0x387   : > { %p1477_p3 = scmp.ne.s32.totalorder %s946_s14, %s1476_s26  ;;  %p1483_p13 = scmp.lt.s32.totalorder %s946_s14, %s946_s14 }
 0x388   : > { %p1484_p1 = scmp.lt.s32.totalorder %s1482_s27, %s1476_s26 }
 0x389   : > { %p1478_p7 = pnand %p1477_p3, %p1275_p2 }
 0x38a   : > { %p1485_p4 = por %p1484_p1, %p1483_p13 }
 0x38b   : > { %p1479_p11 = pneg %p1478_p7 }
 0x38d   : > { %p1486_p5 = pnand %p1485_p4, %p1479_p11 }
 0x38f   : > { %1489 = shalt.err (!%p1486_p5)
}
 0x390   : > { %s2057_s16 = sld [smem:[#allocation25_spill]] }
 0x396   : > { %s1490_s22 = scalar_lea.hbm %s2057_s16, 16 }
 0x397   : > { %p1491_p8 = scmp.ne.s32.totalorder %s2057_s16, %s1490_s22  ;;  %p1496_p12 = scmp.lt.u32.totalorder %s1490_s22, %s2057_s16 }
 0x399   : > { %p1492_p9 = pnand %p1491_p8, %p1275_p2 }
 0x39b   : > { %p1493_p10 = pneg %p1492_p9 }
 0x39d   : > { %p1498_p0 = pnand %p1496_p12, %p1493_p10 }
 0x39f   : > { %1501 = shalt.err (!%p1498_p0)
}
 0x3a0   : > { %1252 = dma.vmem_to_hbm [thread:$0]  (%p1275_p2), %s946_s14, 16, %s2057_s16, [#allocation16]  }
 0x3a1   : > { %1531 = dma.done.wait (%p1275_p2), [#allocation7], 16  }
 0x3a2   : > { %1533 = vsyncadd (%p1275_p2), [#allocation7], 4294967280 }
 0x3a3   : > { %1535 = dma.done.wait (%p1275_p2), [#allocation6], 2048  }
 0x3a4   : > { %1537 = vsyncadd (%p1275_p2), [#allocation6], 4294965248 }
 0x3a5   : > { %1539 = dma.done.wait (%p1275_p2), [#allocation16], 16  }
 0x3a6   : > { %1541 = vsyncadd (%p1275_p2), [#allocation16], 4294967280 }
 0x3a7   : > { %961 = sfence }
 0x3a8 PF: > { %s2058_s30 = sld [smem:[#allocation23_spill]]  ;;  %s2059_s25 = sld [smem:[#allocation24_spill]] }
 0x3a9   : > { %s2060_s27 = smov %s1548_s28  ;;  %s2061_s28 = smov %s1552_s29 }
 0x3ae   : > { %p24_p6 = scmp.ge.s32.totalorder %s2058_s30, 5   ;;  %s2062_s29 = smov %s2059_s25 }
 0x3b0   :  { %26 = sbr.rel (!%p24_p6) target bundleno = 10 (0xa), region = 123 }
 0x3b7   :  { %967 = vsyncpa [#allocation5], 1 }
 0x3b8   :  { %969 = vsyncpa [#allocation5 + $0x1], 1 }
 0x3b9   :  { %970 = vsyncpa [#allocation9], 1 }
 0x3ba   :  { %971 = vsyncpa [#allocation12], 1 }
 0x3bb   :  { %973 = vsyncpa [#allocation12 + $0x1], 1 }
 0x3bc   :  { %974 = vsyncpa [#allocation6], 1 }
 0x3bd   :  { %976 = vsyncpa [#allocation6 + $0x1], 1 }
 0x3be   :  { %977 = vsyncpa [#allocation16], 1 }
 0x3bf   :  { %978 = vsyncpa [#allocation7], 1 }
 0x3c0   :  { %980 = vsyncpa [#allocation7 + $0x1], 1 }

// kernel: tpu_custom_call.1
= control target key start
LH: loop header
LB: loop body
LE: loop exit
PB: predicated region body
PF: predicated region fallthrough
CT: control target
= control target key end

     0   :  { %s2026_s0 = inlined_call_operand.vmem [shape: f32[270,128], index: 0, kind: input, shape index: {}]   ;;  %s2027_s1 = inlined_call_operand.hbm [shape: f32[128,128], index: 1, kind: input, shape index: {}]   ;;  %s2028_s2 = inlined_call_operand.hbm [shape: f32[128,128], index: 2, kind: input, shape index: {}, may-alias: {2,7}]   ;;  %s2029_s3 = inlined_call_operand.vmem [shape: f32[1,128], index: 3, kind: input, shape index: {}]   ;;  %s2030_s4 = inlined_call_operand.hbm [shape: f32[1,128], index: 4, kind: input, shape index: {}, may-alias: {4,8}]   ;;  %s2031_s5 = inlined_call_operand.hbm [shape: f32[270,128], index: 5, kind: input, shape index: {}]   ;;  %s2032_s6 = inlined_call_operand.hbm [shape: f32[1,1], index: 6, kind: output, shape index: {0}]   ;;  %s2033_s7 = inlined_call_operand.hbm [shape: f32[128,128], index: 7, kind: output, shape index: {1}, may-alias: {2,7}]   ;;  %s2034_s8 = inlined_call_operand.hbm [shape: f32[1,128], index: 8, kind: output, shape index: {2}, may-alias: {4,8}]  }
   0x1   :  { %2041 = sst [smem:[#allocation25_spill]] %s2034_s8 }
   0x2   :  { %14 = vsyncpa [#allocation5], 0 }
   0x3   :  { %15 = vsyncpa [#allocation9], 0 }
   0x4   :  { %16 = vsyncpa [#allocation12], 0 }
   0x5   :  { %18 = vsyncpa [#allocation12 + $0x1], 0 }
   0x6   :  { %19 = vsyncpa [#allocation7], 0 }
   0x7   :  { %20 = vsyncpa [#allocation6], 0 }
   0x8   :  { %21 = vsyncpa [#allocation16], 0  ;;  %s1617_s27 = smov 0   ;;  %s1619_s28 = smov 0  }
   0x9   :  { %s1621_s29 = smov 0   ;;  %s1623_s30 = smov 0  }
   0xa LB: > { %s1636_s9 = sadd.s32 4294967295, %s1556_s30   ;;  %s1639_s10 = sadd.s32 1, %s1556_s30   ;;  %s1556_s30 = sphi %s1623_s30, %s2058_s30   ;;  %s1552_s29 = sphi %s1621_s29, %s2062_s29   ;;  %s1548_s28 = sphi %s1619_s28, %s2061_s28   ;;  %s1544_s27 = sphi %s1617_s27, %s2060_s27  }
   0xb   : > { %2042 = sst [smem:[#allocation23_spill]] %s1639_s10  ;;  %s141_s11 = ssub.s32 %s1556_s30, %s1639_s10 }
   0xc   : > { %s144_s12 = sadd.s32 1, %s1552_s29  ;;  %p142_p0 = scmp.eq.s32.totalorder %s141_s11, 0 }
   0xd   : > { %p151_p1 = scmp.ne.s32.totalorder %s1552_s29, %s1548_s28  ;;  %p152_p2 = scmp.eq.s32.totalorder %s1556_s30, 0 }
   0xe   : > { %p157_p3 = scmp.ne.s32.totalorder %s1548_s28, %s1544_s27  ;;  %p2035_p5 = scmp.eq.s32.totalorder %s1636_s9, 0 }
   0xf   : > { %s1649_s13 = scalar_select %p142_p0, %s1552_s29, %s144_s12  }
  0x10   : > { %p1651_p4 = por %p152_p2, %p151_p1  ;;  %p1064_p6 = scmp.ge.s32.totalorder %s1556_s30, 1 }
  0x11   : > { %2043 = sst [smem:[#allocation24_spill]] %s1649_s13  ;;  %p231_p7 = scmp.lt.s32.totalorder %s1556_s30, 4 }
  0x12   : > { %s2044_s14 = scalar_select %p1651_p4, 1, 0 }
  0x13   : > { %p1660_p8 = por %p2035_p5, %p157_p3  ;;  %p1665_p10 = pnand %p1064_p6, %p231_p7 }
  0x14   : > { %s1558_s17 = smov [#allocation8]   ;;  %s1559_s20 = smov [#allocation4]  }
  0x15   : > { %s2045_s15 = scalar_select %p1660_p8, 1, 0 }
  0x16   : > { %s2046_s16 = scalar_select %p1665_p10, 1, 0 }
  0x17   : > { %p1259_p11 = pneg %p1665_p10  ;;  %s256_s18 = sshll.u32 %s1558_s17, 4  ;;  %s1671_s18 = int_to_ptr.vmem [resolvable:$true] %s256_s18 }
  0x18   : > { %s243_s21 = sshll.u32 %s1559_s20, 4  ;;  %s1560_s22 = smov [#allocation10]   ;;  %s1679_s21 = int_to_ptr.vmem [resolvable:$true] %s243_s21 }
  0x19   : > { %p1675_p12 = pnand %p1259_p11, %p2035_p5  ;;  %s1681_s23 = sshll.u32 %s1560_s22, 4  ;;  %s274_s23 = int_to_ptr.vmem [resolvable:$true] %s1681_s23 }
  0x1a   : > { %s1326_s26 = scalar_lea.hbm %s2028_s2, 2048 }
  0x1b   : > { %p1327_p13 = scmp.ne.s32.totalorder %s2028_s2, %s1326_s26  ;;  %p1691_p0 = pneg %p1675_p12 }
  0x1c   : > { %p1333_p3 = scmp.lt.u32.totalorder %s1326_s26, %s2028_s2 }
  0x1d   : > { %p1329_p1 = pnand %p1691_p0, %p1327_p13 }
  0x1f   : > { %p1330_p2 = pneg %p1329_p1 }
  0x21   : > { %p1335_p6 = pnand %p1333_p3, %p1330_p2 }
  0x23   : > { %1338 = shalt.err (!%p1335_p6)
}
  0x24   : > { %s1339_s22 = scalar_lea.vmem %s1671_s18, 2048  ;;  %p1347_p5 = scmp.lt.s32.totalorder %s1671_s18, %s1671_s18 }
  0x25   : > { %p1340_p7 = scmp.ne.s32.totalorder %s1671_s18, %s1339_s22  ;;  %p1348_p8 = scmp.lt.s32.totalorder %s1339_s22, %s1339_s22 }
  0x27   : > { %p1342_p11 = pnand %p1340_p7, %p1691_p0  ;;  %p1349_p13 = por %p1348_p8, %p1347_p5 }
  0x29   : > { %p1343_p9 = pneg %p1342_p11 }
  0x2b   : > { %p1350_p1 = pnand %p1349_p13, %p1343_p9 }
  0x2d   : > { %1353 = shalt.err (!%p1350_p1)
}
  0x2e   : > { %s1561_s24 = smov 128   ;;  %s1562_s25 = smov 8  }
  0x2f   : > { %1265 = dma.hbm_to_vmem [thread:$0]  (!%p1675_p12), %s2028_s2, 2048, %s1671_s18, [#allocation9], %s1561_s24, %s1561_s24, %s1562_s25  }
  0x30   : > { %s1354_s20 = scalar_lea.hbm %s2027_s1, 2048 }
  0x31   : > { %p1355_p5 = scmp.ne.s32.totalorder %s2027_s1, %s1354_s20  ;;  %p1361_p2 = scmp.lt.u32.totalorder %s1354_s20, %s2027_s1 }
  0x33   : > { %p1357_p8 = pnand %p1355_p5, %p1691_p0 }
  0x35   : > { %p1358_p9 = pneg %p1357_p8 }
  0x37   : > { %p1363_p3 = pnand %p1361_p2, %p1358_p9 }
  0x39   : > { %1366 = shalt.err (!%p1363_p3)
}
  0x3a   : > { %s1367_s18 = scalar_lea.vmem %s1679_s21, 2048  ;;  %p1375_p13 = scmp.lt.s32.totalorder %s1679_s21, %s1679_s21 }
  0x3b   : > { %p1368_p6 = scmp.ne.s32.totalorder %s1679_s21, %s1367_s18  ;;  %p1376_p1 = scmp.lt.s32.totalorder %s1367_s18, %s1367_s18 }
  0x3d   : > { %p1370_p7 = pnand %p1368_p6, %p1691_p0  ;;  %p1377_p5 = por %p1376_p1, %p1375_p13 }
  0x3f   : > { %p1371_p11 = pneg %p1370_p7 }
  0x41   : > { %p1378_p8 = pnand %p1377_p5, %p1371_p11 }
  0x43   : > { %1381 = shalt.err (!%p1378_p8)
}
  0x44   : > { %1262 = dma.hbm_to_vmem [thread:$0]  (!%p1675_p12), %s2027_s1, 2048, %s1679_s21, [#allocation5], %s1561_s24, %s1561_s24, %s1562_s25  }
  0x45   : > { %s1382_s27 = scalar_lea.hbm %s2030_s4, 16 }
  0x46   : > { %p1383_p9 = scmp.ne.s32.totalorder %s2030_s4, %s1382_s27  ;;  %p1389_p6 = scmp.lt.u32.totalorder %s1382_s27, %s2030_s4 }
  0x48   : > { %p1385_p2 = pnand %p1383_p9, %p1691_p0 }
  0x4a   : > { %p1386_p3 = pneg %p1385_p2 }
  0x4c   : > { %p1391_p7 = pnand %p1389_p6, %p1386_p3 }
  0x4e   : > { %1394 = shalt.err (!%p1391_p7)
}
  0x4f   : > { %s1395_s18 = scalar_lea.vmem %s274_s23, 16  ;;  %s1402_s21 = scalar_lea.vmem %s274_s23, 32 }
  0x50   : > { %p1396_p11 = scmp.ne.s32.totalorder %s274_s23, %s1395_s18  ;;  %p1403_p5 = scmp.lt.s32.totalorder %s274_s23, %s274_s23 }
  0x51   : > { %p1404_p8 = scmp.lt.s32.totalorder %s1402_s21, %s1395_s18 }
  0x52   : > { %p1398_p13 = pnand %p1396_p11, %p1691_p0 }
  0x53   : > { %p1405_p10 = por %p1404_p8, %p1403_p5 }
  0x54   : > { %p1399_p1 = pneg %p1398_p13 }
  0x56   : > { %p1406_p4 = pnand %p1405_p10, %p1399_p1 }
  0x58   : > { %1409 = shalt.err (!%p1406_p4)
}
  0x59   : > { %1268 = dma.hbm_to_vmem [thread:$0]  (!%p1675_p12), %s2030_s4, 16, %s274_s23, [#allocation9]  }
  0x5a   : > { %p1068_p9 = scmp.ge.s32.totalorder %s1556_s30, 3 }
  0x5b   : > { %p2049_p2 = scmp.ne.s32.totalorder (!%p1068_p9), %s2044_s14, 0 }
  0x5c   : > { %280 = sbr.rel (%p1068_p9) target bundleno = 134 (0x86), region = 32 }
  0x63   : > { %300 = sbr.rel (!%p2049_p2) target bundleno = 134 (0x86), region = 40  ;;  %s301_s12 = sand.u32 (%p2049_p2), 1, %s1552_s29  }
  0x64   : > { %s1070_s8 = sshll.u32 (%p2049_p2), %s1556_s30, 4  ;;  %s1069_s10 = sshll.u32 (%p2049_p2), %s301_s12, 7 }
  0x65   : > { %s307_s13 = ssub.s32 (%p2049_p2), 34, %s1070_s8  ;;  %s1762_s27 = scalar_lea.sflag (%p2049_p2), [#allocation12], %s301_s12 }
  0x66   : > { %p308_p10 = scmp.lt.s32.totalorder (%p2049_p2), %s307_s13, 16  ;;  %s305_s23 = scalar_lea.vmem (%p2049_p2), [#allocation11], %s1069_s10 }
  0x6a   : > { %s2064_s13 = smov (!%p308_p10, %s307_s13), 16 }
  0x6b   : > { %s1759_s26 = sshll.u32 %s2064_s13, 7 }
  0x6c   : > { %s312_s19 = ssub.s32 2048, %s1759_s26 }
  0x6d   : > { %313 = vsyncadd %s1762_s27, %s312_s19  ;;  %p1072_p4 = scmp.ne.s32.totalorder %s1759_s26, 0  ;;  %s1095_s14 = sshll.u32 %s1556_s30, 11 }
  0x6e   : > { %s1770_s20 = scalar_lea.hbm %s2031_s5, %s1095_s14  ;;  %s318_s22 = sshll.u32 %s305_s23, 4  ;;  %s1772_s22 = int_to_ptr.vmem [resolvable:$true] %s318_s22 }
  0x6f   : > { %s1410_s18 = scalar_lea.hbm %s1770_s20, %s1759_s26  ;;  %s1414_s30 = scalar_lea.hbm %s2031_s5, 4352 }
  0x70   : > { %p1411_p12 = scmp.ne.s32.totalorder %s1770_s20, %s1410_s18  ;;  %p1415_p6 = scmp.lt.u32.totalorder %s1770_s20, %s2031_s5 }
  0x71   : > { %p1416_p7 = scmp.lt.u32.totalorder %s1414_s30, %s1410_s18  ;;  %p1418_p13 = scmp.lt.u32.totalorder %s1410_s18, %s1770_s20 }
  0x72   : > { %p1412_p0 = pnand %p1411_p12, %p1072_p4 }
  0x73   : > { %p1417_p11 = por %p1416_p7, %p1415_p6 }
  0x74   : > { %p1413_p3 = pneg %p1412_p0 }
  0x75   : > { %p1419_p1 = por %p1418_p13, %p1417_p11 }
  0x77   : > { %p1420_p5 = pnand %p1419_p1, %p1413_p3 }
  0x79   : > { %1423 = shalt.err (!%p1420_p5)
}
  0x7a   : > { %s1424_s8 = scalar_lea.vmem %s1772_s22, %s1759_s26  ;;  %s1563_s10 = smov [#allocation11]  }
  0x7b   : > { %p1425_p8 = scmp.ne.s32.totalorder %s1772_s22, %s1424_s8  ;;  %s1428_s13 = sshll.u32 %s1563_s10, 4  ;;  %s1429_s13 = int_to_ptr.vmem [resolvable:$false] %s1428_s13 }
  0x7c   : > { %s1430_s19 = scalar_lea.vmem %s1429_s13, 4096  ;;  %p1431_p10 = scmp.lt.s32.totalorder %s1772_s22, %s1429_s13 }
  0x7d   : > { %p1426_p9 = pnand %p1425_p8, %p1072_p4  ;;  %p1432_p12 = scmp.lt.s32.totalorder %s1430_s19, %s1424_s8 }
  0x7f   : > { %p1427_p2 = pneg %p1426_p9  ;;  %p1433_p0 = por %p1432_p12, %p1431_p10 }
  0x81   : > { %p1434_p6 = pnand %p1433_p0, %p1427_p2 }
  0x83   : > { %1437 = shalt.err (!%p1434_p6)
}
  0x84   : > { %s1564_s23 = smov 128   ;;  %s1565_s14 = smov 8  }
  0x85   : > { %324 = dma.hbm_to_vmem [thread:$0]  (%p1072_p4), %s1770_s20, %s1759_s26, %s1772_s22, %s1762_s27, %s1564_s23, %s1564_s23, %s1565_s14  }
  0x86 PF: > { %p2050_p3 = scmp.ne.s32.totalorder %s2046_s16, 0 }
  0x87   : > { %p2051_p7 = scmp.eq.s32.totalorder (!%p2050_p3), %s1636_s9, 0 }
  0x88   : > { %330 = sbr.rel (%p2050_p3) target bundleno = 936 (0x3a8), region = 44 }
  0x8f   : > { %1519 = dma.done.wait (%p2051_p7), [#allocation5], 2048   ;;  %p2052_p11 = pmov %p2051_p7 }
  0x90   : > { %p2053_p13 = pmov %p2051_p7 }
  0x91   : > { %1521 = vsyncadd (%p2052_p11), [#allocation5], 4294965248 }
  0x92   : > { %1523 = dma.done.wait (%p2053_p13), [#allocation9], 2064   ;;  %p2054_p1 = pmov %p2051_p7 }
  0x93   : > { %s344_s26 = sand.u32 1, %s1548_s28   ;;  %p2055_p4 = scmp.ne.s32.totalorder %s2045_s15, 0 }
  0x94   : > { %1525 = vsyncadd (%p2054_p1), [#allocation9], 4294965232  ;;  %s1080_s27 = sshll.u32 %s344_s26, 7  ;;  %s345_s11 = scalar_lea.sflag [#allocation12], %s344_s26 }
  0x95   : > { %s1810_s17 = scalar_lea.vmem [#allocation11], %s1080_s27 }
  0x96   : > { %1527 = dma.done.wait (%p2055_p4), %s345_s11, 2048  }
  0x97   : > { %1529 = vsyncadd (%p2055_p4), %s345_s11, 4294965248  ;;  %s1081_s16 = sshll.u32 %s1636_s9, 4  ;;  %p2056_p8 = scmp.ne.s32.totalorder %s1636_s9, 0 }
  0x98   : > { %p390_p5 = scmp.lt.s32.totalorder %s1081_s16, 33  ;;  %v408_v0 = vld [vmem:[#allocation4] sm:$0xff] (!%p2056_p8)  ;;  %v409_v2 = vld [vmem:[#allocation4 + $0x8] sm:$0xff] (!%p2056_p8)  ;;  %v410_v5 = vld [vmem:[#allocation4 + $0x10] sm:$0xff] (!%p2056_p8) }
  0x99   : > { %407 = sbr.rel (%p2056_p8) target bundleno = 348 (0x15c), region = 64  ;;  %v424_v1 = vld [vmem:[#allocation8] sm:$0xff] (!%p2056_p8)  ;;  %v425_v4 = vld [vmem:[#allocation8 + $0x8] sm:$0xff] (!%p2056_p8)  ;;  %v426_v6 = vld [vmem:[#allocation8 + $0x10] sm:$0xff] (!%p2056_p8) }
  0x9a   : > { %s2066_s16 = smov (!%p390_p5, %s1081_s16), 33  ;;  %v440_v3 = vadd.f32 (!%p2056_p8), %v424_v1, %v408_v0  ;;  %v441_v7 = vadd.f32 (!%p2056_p8), %v425_v4, %v409_v2  ;;  %v442_v8 = vadd.f32 (!%p2056_p8), %v426_v6, %v410_v5  ;;  %v411_v9 = vld [vmem:[#allocation4 + $0x18] sm:$0xff] (!%p2056_p8)  ;;  %v412_v11 = vld [vmem:[#allocation4 + $0x20] sm:$0xff] (!%p2056_p8)  ;;  %v413_v15 = vld [vmem:[#allocation4 + $0x28] sm:$0xff] (!%p2056_p8)  ;;  %v1566_v4 = vmov (!%p2056_p8), 0.0  }
  0x9b   : > { %s1082_s20 = sshll.u32 %s2066_s16, 3  ;;  %v427_v10 = vld [vmem:[#allocation8 + $0x18] sm:$0xff] (!%p2056_p8)  ;;  %v428_v14 = vld [vmem:[#allocation8 + $0x20] sm:$0xff] (!%p2056_p8)  ;;  %v429_v16 = vld [vmem:[#allocation8 + $0x28] sm:$0xff] (!%p2056_p8)  ;;  %541 = vst [vmem:[#allocation2] sm:$0x1] (!%p2056_p8), %v1566_v4 }
  0x9c   : > { %s1820_s21 = scalar_lea.vmem %s2026_s0, %s1082_s20  ;;  %v456_v12 = vmul.f32 (!%p2056_p8), 0.5, %v440_v3  ;;  %v443_v13 = vadd.f32 (!%p2056_p8), %v427_v10, %v411_v9  ;;  %v457_v17 = vmul.f32 (!%p2056_p8), 0.5, %v441_v7  ;;  %v458_v18 = vmul.f32 (!%p2056_p8), 0.5, %v442_v8  ;;  %v414_v21 = vld [vmem:[#allocation4 + $0x30] sm:$0xff] (!%p2056_p8)  ;;  %v415_v23 = vld [vmem:[#allocation4 + $0x38] sm:$0xff] (!%p2056_p8)  ;;  %v416_v27 = vld [vmem:[#allocation4 + $0x40] sm:$0xff] (!%p2056_p8) }
  0x9d   : > { %v444_v19 = vadd.f32 (!%p2056_p8), %v428_v14, %v412_v11  ;;  %v445_v20 = vadd.f32 (!%p2056_p8), %v429_v16, %v413_v15  ;;  %v430_v22 = vld [vmem:[#allocation8 + $0x30] sm:$0xff] (!%p2056_p8)  ;;  %v431_v26 = vld [vmem:[#allocation8 + $0x38] sm:$0xff] (!%p2056_p8)  ;;  %v432_v28 = vld [vmem:[#allocation8 + $0x40] sm:$0xff] (!%p2056_p8) }
  0x9e   : > { %472 = vst [vmem:[#allocation14] sm:$0xff] (!%p2056_p8), %v456_v12  ;;  %488 = vxpose.xlu0.b32.start [1/16] (!%p2056_p8), %v456_v12, 128  ;;  %v459_v24 = vmul.f32 (!%p2056_p8), 0.5, %v443_v13  ;;  %v446_v25 = vadd.f32 (!%p2056_p8), %v430_v22, %v414_v21  ;;  %473 = vst [vmem:[#allocation14 + $0x8] sm:$0xff] (!%p2056_p8), %v457_v17  ;;  %v447_v31 = vadd.f32 (!%p2056_p8), %v431_v26, %v415_v23  ;;  %v417_v33 = vld [vmem:[#allocation4 + $0x48] sm:$0xff] (!%p2056_p8)  ;;  %v418_v35 = vld [vmem:[#allocation4 + $0x50] sm:$0xff] (!%p2056_p8) }
  0x9f   : > { %474 = vst [vmem:[#allocation14 + $0x10] sm:$0xff] (!%p2056_p8), %v458_v18  ;;  %v460_v29 = vmul.f32 (!%p2056_p8), 0.5, %v444_v19  ;;  %v461_v30 = vmul.f32 (!%p2056_p8), 0.5, %v445_v20  ;;  %v448_v32 = vadd.f32 (!%p2056_p8), %v432_v28, %v416_v27  ;;  %v433_v34 = vld [vmem:[#allocation8 + $0x48] sm:$0xff] (!%p2056_p8)  ;;  %v434_v38 = vld [vmem:[#allocation8 + $0x50] sm:$0xff] (!%p2056_p8)  ;;  %v419_v39 = vld [vmem:[#allocation4 + $0x58] sm:$0xff] (!%p2056_p8) }
  0xa0   : > { %475 = vst [vmem:[#allocation14 + $0x18] sm:$0xff] %v459_v24  ;;  %v462_v36 = vmul.f32 0.5, %v446_v25  ;;  %v449_v37 = vadd.f32 %v433_v34, %v417_v33  ;;  %v435_v40 = vld [vmem:[#allocation8 + $0x58] sm:$0xff]  ;;  %v463_v41 = vmul.f32 0.5, %v447_v31  ;;  %v450_v43 = vadd.f32 %v434_v38, %v418_v35  ;;  %v420_v45 = vld [vmem:[#allocation4 + $0x60] sm:$0xff]  ;;  %v421_v47 = vld [vmem:[#allocation4 + $0x68] sm:$0xff] }
  0xa1   : > { %476 = vst [vmem:[#allocation14 + $0x20] sm:$0xff] %v460_v29  ;;  %477 = vst [vmem:[#allocation14 + $0x28] sm:$0xff] %v461_v30  ;;  %v464_v42 = vmul.f32 0.5, %v448_v32  ;;  %v451_v44 = vadd.f32 %v435_v40, %v419_v39  ;;  %v436_v46 = vld [vmem:[#allocation8 + $0x60] sm:$0xff]  ;;  %v437_v50 = vld [vmem:[#allocation8 + $0x68] sm:$0xff] }
  0xa2   : > { %489 = vxpose.xlu0.b32.cont [2/16] %v457_v17, 128  ;;  %478 = vst [vmem:[#allocation14 + $0x30] sm:$0xff] %v462_v36  ;;  %v465_v48 = vmul.f32 0.5, %v449_v37  ;;  %v452_v49 = vadd.f32 %v436_v46, %v420_v45  ;;  %v422_v51 = vld [vmem:[#allocation4 + $0x70] sm:$0xff]  ;;  %479 = vst [vmem:[#allocation14 + $0x38] sm:$0xff] %v463_v41  ;;  %v466_v53 = vmul.f32 0.5, %v450_v43  ;;  %v453_v55 = vadd.f32 %v437_v50, %v421_v47  ;;  %v423_v57 = vld [vmem:[#allocation4 + $0x78] sm:$0xff] }
  0xa3   : > { %v438_v52 = vld [vmem:[#allocation8 + $0x70] sm:$0xff]  ;;  %480 = vst [vmem:[#allocation14 + $0x40] sm:$0xff] %v464_v42  ;;  %v467_v54 = vmul.f32 0.5, %v451_v44  ;;  %v439_v58 = vld [vmem:[#allocation8 + $0x78] sm:$0xff]  ;;  %v537_v1 = vld [vmem:[#allocation10] sm:$0x1] }
  0xa4   : > { %v454_v56 = vadd.f32 %v438_v52, %v422_v51  ;;  %481 = vst [vmem:[#allocation14 + $0x48] sm:$0xff] %v465_v48  ;;  %v468_v59 = vmul.f32 0.5, %v452_v49  ;;  %v455_v60 = vadd.f32 %v439_v58, %v423_v57  ;;  %482 = vst [vmem:[#allocation14 + $0x50] sm:$0xff] %v466_v53  ;;  %v469_v61 = vmul.f32 0.5, %v453_v55  ;;  %v536_v0 = vld [vmem:[%s2029_s3] sm:$0x1] }
  0xa5   : > { %483 = vst [vmem:[#allocation14 + $0x58] sm:$0xff] %v467_v54  ;;  %v538_v2 = vadd.f32 %v537_v1, %v536_v0 }
  0xa6   : > { %v470_v62 = vmul.f32 0.5, %v454_v56  ;;  %490 = vxpose.xlu0.b32.cont [3/16] %v458_v18, 128  ;;  %484 = vst [vmem:[#allocation14 + $0x60] sm:$0xff] %v468_v59  ;;  %v471_v63 = vmul.f32 0.5, %v455_v60  ;;  %485 = vst [vmem:[#allocation14 + $0x68] sm:$0xff] %v469_v61 }
  0xa7   : > { %v539_v3 = vmul.f32 0.5, %v538_v2 }
  0xa8   : > { %486 = vst [vmem:[#allocation14 + $0x70] sm:$0xff] %v470_v62  ;;  %487 = vst [vmem:[#allocation14 + $0x78] sm:$0xff] %v471_v63 }
  0xa9   : > { %540 = vst [vmem:[#allocation15] sm:$0x1] %v539_v3 }
  0xaa   : > { %491 = vxpose.xlu0.b32.cont [4/16] %v459_v24, 128 }
  0xae   : > { %492 = vxpose.xlu0.b32.cont [5/16] %v460_v29, 128 }
  0xb2   : > { %493 = vxpose.xlu0.b32.cont [6/16] %v461_v30, 128 }
  0xb6   : > { %494 = vxpose.xlu0.b32.cont [7/16] %v462_v36, 128 }
  0xba   : > { %495 = vxpose.xlu0.b32.cont [8/16] %v463_v41, 128 }
  0xbe   : > { %496 = vxpose.xlu0.b32.cont [9/16] %v464_v42, 128 }
  0xc2   : > { %497 = vxpose.xlu0.b32.cont [10/16] %v465_v48, 128 }
  0xc6   : > { %498 = vxpose.xlu0.b32.cont [11/16] %v466_v53, 128 }
  0xca   : > { %499 = vxpose.xlu0.b32.cont [12/16] %v467_v54, 128 }
  0xce   : > { %500 = vxpose.xlu0.b32.cont [13/16] %v468_v59, 128 }
  0xd2   : > { %501 = vxpose.xlu0.b32.cont [14/16] %v469_v61, 128 }
  0xd6   : > { %502 = vxpose.xlu0.b32.cont [15/16] %v470_v62, 128 }
  0xda   : > { %503 = vxpose.xlu0.b32.end [16/16] %v471_v63, 128 }
 0x11e   : > { %v504_v5 = vpop.trf.xlu0 }
 0x11f   : > { %520 = vst [vmem:[#allocation3] sm:$0xff] %v504_v5 }
 0x122   : > { %v505_v6 = vpop.trf.xlu0 }
 0x123   : > { %521 = vst [vmem:[#allocation3 + $0x8] sm:$0xff] %v505_v6 }
 0x126   : > { %v506_v7 = vpop.trf.xlu0 }
 0x127   : > { %522 = vst [vmem:[#allocation3 + $0x10] sm:$0xff] %v506_v7 }
 0x12a   : > { %v507_v8 = vpop.trf.xlu0 }
 0x12b   : > { %523 = vst [vmem:[#allocation3 + $0x18] sm:$0xff] %v507_v8 }
 0x12e   : > { %v508_v9 = vpop.trf.xlu0 }
 0x12f   : > { %524 = vst [vmem:[#allocation3 + $0x20] sm:$0xff] %v508_v9 }
 0x132   : > { %v509_v10 = vpop.trf.xlu0 }
 0x133   : > { %525 = vst [vmem:[#allocation3 + $0x28] sm:$0xff] %v509_v10 }
 0x136   : > { %v510_v11 = vpop.trf.xlu0 }
 0x137   : > { %526 = vst [vmem:[#allocation3 + $0x30] sm:$0xff] %v510_v11 }
 0x13a   : > { %v511_v12 = vpop.trf.xlu0 }
 0x13b   : > { %527 = vst [vmem:[#allocation3 + $0x38] sm:$0xff] %v511_v12 }
 0x13e   : > { %v512_v13 = vpop.trf.xlu0 }
 0x13f   : > { %528 = vst [vmem:[#allocation3 + $0x40] sm:$0xff] %v512_v13 }
 0x142   : > { %v513_v14 = vpop.trf.xlu0 }
 0x143   : > { %529 = vst [vmem:[#allocation3 + $0x48] sm:$0xff] %v513_v14 }
 0x146   : > { %v514_v15 = vpop.trf.xlu0 }
 0x147   : > { %530 = vst [vmem:[#allocation3 + $0x50] sm:$0xff] %v514_v15 }
 0x14a   : > { %v515_v16 = vpop.trf.xlu0 }
 0x14b   : > { %531 = vst [vmem:[#allocation3 + $0x58] sm:$0xff] %v515_v16 }
 0x14e   : > { %v516_v17 = vpop.trf.xlu0 }
 0x14f   : > { %532 = vst [vmem:[#allocation3 + $0x60] sm:$0xff] %v516_v17 }
 0x152   : > { %v517_v18 = vpop.trf.xlu0 }
 0x153   : > { %533 = vst [vmem:[#allocation3 + $0x68] sm:$0xff] %v517_v18 }
 0x156   : > { %v518_v19 = vpop.trf.xlu0 }
 0x157   : > { %534 = vst [vmem:[#allocation3 + $0x70] sm:$0xff] %v518_v19 }
 0x15a   : > { %v519_v20 = vpop.trf.xlu0 }
 0x15b   : > { %535 = vst [vmem:[#allocation3 + $0x78] sm:$0xff] %v519_v20 }
 0x15c PF: > { %v558_v21 = vld [vmem:[#allocation3] sm:$0xff]  ;;  %v559_v22 = vld [vmem:[#allocation3 + $0x8] sm:$0xff]  ;;  %v560_v23 = vld [vmem:[#allocation3 + $0x10] sm:$0xff]  ;;  %v775_v61 = vlaneseq  ;;  %s1085_s30 = sshll.u32 %s1636_s9, 7  ;;  %p1086_p9 = scmp.ne.s32.totalorder %s1636_s9, 2 }
 0x15d   : > { %v1184_v24 = vpack.c.bf16 %v559_v22, %v558_v21  ;;  %v561_v25 = vld [vmem:[#allocation3 + $0x18] sm:$0xff]  ;;  %v562_v27 = vld [vmem:[#allocation3 + $0x20] sm:$0xff]  ;;  %v563_v28 = vld [vmem:[#allocation3 + $0x28] sm:$0xff]  ;;  %v1847_v0 = vstv %s1085_s30 }
 0x15e   : > { %v1188_v26 = vpack.c.bf16 %v561_v25, %v560_v23  ;;  %v1192_v29 = vpack.c.bf16 %v563_v28, %v562_v27  ;;  %v542_v30 = vld [vmem:[%s1820_s21] sm:$0xff]  ;;  %v564_v31 = vld [vmem:[#allocation3 + $0x30] sm:$0xff]  ;;  %v567_v36 = vld [vmem:[#allocation3 + $0x48] sm:$0xff]  ;;  %v1843_v62 = vshrl.u32 %v775_v61, 7 }
 0x15f   : > { %1185 = vmatprep.subr.bf16.mxu0 %v1184_v24  ;;  %1216 = vmatprep.subr.bf16.mxu1 %v1184_v24  ;;  %v565_v32 = vld [vmem:[#allocation3 + $0x38] sm:$0xff]  ;;  %v566_v35 = vld [vmem:[#allocation3 + $0x40] sm:$0xff]  ;;  %v568_v38 = vld [vmem:[#allocation3 + $0x50] sm:$0xff] }
 0x160   : > { %1187 = vmatpush3.bf16.msra.mxu0 %v1184_v24  ;;  %1224 = vmatpush3.bf16.msra.mxu1 %v1184_v24  ;;  %v550_v33 = vld [vmem:[%s1820_s21 + $0x40] sm:$0xff]  ;;  %v1196_v34 = vpack.c.bf16 %v565_v32, %v564_v31  ;;  %v1200_v37 = vpack.c.bf16 %v567_v36, %v566_v35  ;;  %v571_v42 = vld [vmem:[#allocation3 + $0x68] sm:$0xff]  ;;  %v572_v44 = vld [vmem:[#allocation3 + $0x70] sm:$0xff]  ;;  %v777_v63 = vadd.s32 8, %v1843_v62  ;;  %v793_v5 = vadd.s32 %v1847_v0, %v1843_v62 }
 0x161   : > { %1189 = vmatprep.subr.bf16.mxu0 %v1188_v26  ;;  %1217 = vmatprep.subr.bf16.mxu1 %v1188_v26  ;;  %v569_v39 = vld [vmem:[#allocation3 + $0x58] sm:$0xff]  ;;  %v570_v41 = vld [vmem:[#allocation3 + $0x60] sm:$0xff]  ;;  %v544_v49 = vld [vmem:[%s1820_s21 + $0x10] sm:$0xff]  ;;  %v779_v6 = vadd.s32 24, %v1843_v62  ;;  %v778_v7 = vadd.s32 16, %v1843_v62  ;;  %v781_v12 = vadd.s32 40, %v1843_v62 }
 0x162   : > { %1160 = vmatprep.mubr.f32.mxu0 %v542_v30  ;;  %1172 = vmatprep.mubr.f32.mxu1 %v550_v33  ;;  %v1204_v40 = vpack.c.bf16 %v569_v39, %v568_v38  ;;  %v1208_v43 = vpack.c.bf16 %v571_v42, %v570_v41  ;;  %v573_v45 = vld [vmem:[#allocation3 + $0x78] sm:$0xff]  ;;  %v543_v47 = vld [vmem:[%s1820_s21 + $0x8] sm:$0xff]  ;;  %v552_v50 = vld [vmem:[%s1820_s21 + $0x50] sm:$0xff]  ;;  %v794_v2 = vadd.s32 %v1847_v0, %v777_v63  ;;  %v780_v13 = vadd.s32 32, %v1843_v62 }
 0x163   : > { %v1212_v46 = vpack.c.bf16 %v573_v45, %v572_v44  ;;  %v551_v48 = vld [vmem:[%s1820_s21 + $0x48] sm:$0xff]  ;;  %v545_v51 = vld [vmem:[%s1820_s21 + $0x18] sm:$0xff]  ;;  %v546_v53 = vld [vmem:[%s1820_s21 + $0x20] sm:$0xff]  ;;  %v783_v16 = vadd.s32 56, %v1843_v62  ;;  %v782_v17 = vadd.s32 48, %v1843_v62  ;;  %vm809_vm1 = vcmp.lt.s32.totalorder %v793_v5, 270 }
 0x164   : > { %1191 = vmatpush3.bf16.msra.mxu0 %v1188_v26  ;;  %1225 = vmatpush3.bf16.msra.mxu1 %v1188_v26  ;;  %v553_v52 = vld [vmem:[%s1820_s21 + $0x58] sm:$0xff]  ;;  %v554_v54 = vld [vmem:[%s1820_s21 + $0x60] sm:$0xff]  ;;  %v547_v55 = vld [vmem:[%s1820_s21 + $0x28] sm:$0xff]  ;;  %vm810_vm0 = vcmp.lt.s32.totalorder %v794_v2, 270  ;;  %v796_v22 = vadd.s32 %v1847_v0, %v779_v6  ;;  %v795_v23 = vadd.s32 %v1847_v0, %v778_v7  ;;  %v797_v30 = vadd.s32 %v1847_v0, %v780_v13 }
 0x165   : > { %1193 = vmatprep.subr.bf16.mxu0 %v1192_v29  ;;  %1218 = vmatprep.subr.bf16.mxu1 %v1192_v29  ;;  %v555_v56 = vld [vmem:[%s1820_s21 + $0x68] sm:$0xff]  ;;  %v548_v57 = vld [vmem:[%s1820_s21 + $0x30] sm:$0xff]  ;;  %v549_v59 = vld [vmem:[%s1820_s21 + $0x38] sm:$0xff]  ;;  %v1880_v35 = vadd.s32 %v1847_v0, %v782_v17  ;;  %v785_v38 = vadd.s32 72, %v1843_v62  ;;  %v784_v39 = vadd.s32 64, %v1843_v62  ;;  %v786_v2 = vadd.s32 80, %v1843_v62 }
 0x166   : > { %v556_v58 = vld [vmem:[%s1820_s21 + $0x70] sm:$0xff]  ;;  %v557_v60 = vld [vmem:[%s1820_s21 + $0x78] sm:$0xff]  ;;  %v1849_v1 = vld [vmem:[#allocation15] ss:$0 sm:$0xff]  ;;  %vm812_vm2 = vcmp.lt.s32.totalorder %v796_v22, 270  ;;  %vm811_vm3 = vcmp.lt.s32.totalorder %v795_v23, 270 }
 0x167   : > { %v727_v4 = vld [vmem:[%s1810_s17 + $0x8] sm:$0xff]  ;;  %v726_v11 = vld [vmem:[%s1810_s17] sm:$0xff]  ;;  %v729_v21 = vld [vmem:[%s1810_s17 + $0x18] sm:$0xff]  ;;  %vm813_vm5 = vcmp.lt.s32.totalorder %v797_v30, 270  ;;  %vm815_vm7 = vcmp.lt.s32.totalorder %v1880_v35, 270 }
 0x168   : > { %1195 = vmatpush3.bf16.msra.mxu0 %v1192_v29  ;;  %1226 = vmatpush3.bf16.msra.mxu1 %v1192_v29  ;;  %v728_v28 = vld [vmem:[%s1810_s17 + $0x10] sm:$0xff]  ;;  %v1872_v29 = vadd.s32 %v1847_v0, %v781_v12  ;;  %v733_v61 = vld [vmem:[%s1810_s17 + $0x38] sm:$0xff] }
 0x169   : > { %1197 = vmatprep.subr.bf16.mxu0 %v1196_v34  ;;  %1219 = vmatprep.subr.bf16.mxu1 %v1196_v34  ;;  %v732_v7 = vld [vmem:[%s1810_s17 + $0x30] sm:$0xff] }
 0x16a   : > { %vm814_vm4 = vcmp.lt.s32.totalorder %v1872_v29, 270 }
 0x16c   : > { %1199 = vmatpush3.bf16.msra.mxu0 %v1196_v34  ;;  %1227 = vmatpush3.bf16.msra.mxu1 %v1196_v34  ;;  %v1877_v34 = vadd.s32 %v1847_v0, %v783_v16 }
 0x16d   : > { %1201 = vmatprep.subr.bf16.mxu0 %v1200_v37  ;;  %1220 = vmatprep.subr.bf16.mxu1 %v1200_v37 }
 0x16e   : > { %vm816_vm6 = vcmp.lt.s32.totalorder %v1877_v34, 270 }
 0x170   : > { %1203 = vmatpush3.bf16.msra.mxu0 %v1200_v37  ;;  %1228 = vmatpush3.bf16.msra.mxu1 %v1200_v37 }
 0x171   : > { %1205 = vmatprep.subr.bf16.mxu0 %v1204_v40  ;;  %1221 = vmatprep.subr.bf16.mxu1 %v1204_v40 }
 0x174   : > { %1207 = vmatpush3.bf16.msra.mxu0 %v1204_v40  ;;  %1229 = vmatpush3.bf16.msra.mxu1 %v1204_v40 }
 0x175   : > { %1209 = vmatprep.subr.bf16.mxu0 %v1208_v43  ;;  %1222 = vmatprep.subr.bf16.mxu1 %v1208_v43 }
 0x178   : > { %1211 = vmatpush3.bf16.msra.mxu0 %v1208_v43  ;;  %1230 = vmatpush3.bf16.msra.mxu1 %v1208_v43  ;;  %v731_v43 = vld [vmem:[%s1810_s17 + $0x28] sm:$0xff] }
 0x179   : > { %1213 = vmatprep.subr.bf16.mxu0 %v1212_v46  ;;  %1223 = vmatprep.subr.bf16.mxu1 %v1212_v46 }
 0x17c   : > { %1215 = vmatpush3.bf16.msra.mxu0 %v1212_v46  ;;  %1231 = vmatpush3.bf16.msra.mxu1 %v1212_v46 }
 0x17f   : > { %1161 = vmatmul.mubr.f32.vlgmr.msra.gmra.mrb[0].mxu0 %v543_v47  ;;  %1173 = vmatmul.mubr.f32.vlgmr.msra.gmra.mrb[0].mxu1 %v551_v48  ;;  %v730_v48 = vld [vmem:[%s1810_s17 + $0x20] sm:$0xff] }
 0x180   : > { %1163 = vmatprep.mubr.f32.mxu0 %v544_v49  ;;  %1175 = vmatprep.mubr.f32.mxu1 %v552_v50 }
 0x183   : > { %1164 = vmatmul.mubr.f32.gmra.mrb[2].mxu0 %v545_v51  ;;  %1176 = vmatmul.mubr.f32.gmra.mrb[2].mxu1 %v553_v52 }
 0x184   : > { %1166 = vmatprep.mubr.f32.mxu0 %v546_v53  ;;  %1178 = vmatprep.mubr.f32.mxu1 %v554_v54  ;;  %v734_v54 = vld [vmem:[%s1810_s17 + $0x40] sm:$0xff] }
 0x187   : > { %1167 = vmatmul.mubr.f32.gmra.mrb[4].mxu0 %v547_v55  ;;  %1179 = vmatmul.mubr.f32.gmra.mrb[4].mxu1 %v555_v56  ;;  %v1898_v56 = vadd.s32 %v1847_v0, %v785_v38 }
 0x188   : > { %1169 = vmatprep.mubr.f32.mxu0 %v548_v57  ;;  %1181 = vmatprep.mubr.f32.mxu1 %v556_v58  ;;  %v801_v57 = vadd.s32 %v1847_v0, %v784_v39  ;;  %v738_v39 = vld [vmem:[%s1810_s17 + $0x60] sm:$0xff] }
 0x189   : > { %vm818_vm9 = vcmp.lt.s32.totalorder %v1898_v56, 270 }
 0x18a   : > { %vm817_vm8 = vcmp.lt.s32.totalorder %v801_v57, 270 }
 0x18b   : > { %1170 = vmatmul.mubr.f32.gmra.mrb[6].mxu0 %v549_v59  ;;  %1182 = vmatmul.mubr.f32.gmra.mrb[6].mxu1 %v557_v60 }
 0x252   : > { %v1162_v3 = vpop.f32.mrb[0].mxu0  ;;  %v1174_v8 = vpop.f32.mrb[0].mxu1 }
 0x253   : > { %v653_v9 = vadd.f32 %v1162_v3, %v1849_v1  ;;  %v647_v10 = vpop.f32.mrb[1].mxu0  ;;  %v687_v14 = vpop.f32.mrb[1].mxu1  ;;  %v693_v63 = vadd.f32 %v1174_v8, %v1849_v1  ;;  %v736_v8 = vld [vmem:[%s1810_s17 + $0x50] sm:$0xff] }
 0x254   : > { %v648_v15 = vadd.f32 %v1849_v1, %v647_v10  ;;  %v688_v49 = vadd.f32 %v1849_v1, %v687_v14 }
 0x255   : > { %v743_v18 = vsub.f32 %v653_v9, %v727_v4  ;;  %v735_v9 = vld [vmem:[%s1810_s17 + $0x48] sm:$0xff] }
 0x256   : > { %v742_v19 = vsub.f32 %v648_v15, %v726_v11  ;;  %v1165_v20 = vpop.f32.mrb[2].mxu0  ;;  %v1867_v24 = vpop.f32.mrb[2].mxu1  ;;  %v750_v10 = vsub.f32 %v688_v49, %v734_v54  ;;  %v751_v23 = vsub.f32 %v693_v63, %v735_v9  ;;  %v790_v54 = vadd.s32 112, %v1843_v62 }
 0x257   : > { %v759_v25 = vmul.f32 %v743_v18, %v743_v18  ;;  %v663_v26 = vadd.f32 %v1165_v20, %v1849_v1  ;;  %v657_v27 = vpop.f32.mrb[3].mxu0  ;;  %v697_v31 = vpop.f32.mrb[3].mxu1 }
 0x258   : > { %v758_v32 = vmul.f32 %v742_v19, %v742_v19  ;;  %v658_v33 = vadd.f32 %v1849_v1, %v657_v27  ;;  %v698_v11 = vadd.f32 %v1849_v1, %v697_v31  ;;  %v787_v19 = vadd.s32 88, %v1843_v62 }
 0x259   : > { %v858_v36 = vsel %vm810_vm0, %v759_v25, 0.0  ;;  %v745_v37 = vsub.f32 %v663_v26, %v729_v21  ;;  %v803_v25 = vadd.s32 %v1847_v0, %v786_v2  ;;  %v766_v26 = vmul.f32 %v750_v10, %v750_v10 }
 0x25a   : > { %v857_v40 = vsel %vm809_vm1, %v758_v32, 0.0  ;;  %v744_v41 = vsub.f32 %v658_v33, %v728_v28  ;;  %v1168_v42 = vpop.f32.mrb[4].mxu0  ;;  %v1887_v44 = vpop.f32.mrb[4].mxu1  ;;  %v703_v27 = vadd.f32 %v1867_v24, %v1849_v1  ;;  %v752_v28 = vsub.f32 %v698_v11, %v736_v8 }
 0x25b   : > { %v874_v45 = vadd.f32 %v858_v36, %v857_v40  ;;  %v673_v46 = vadd.f32 %v1168_v42, %v1849_v1  ;;  %v667_v47 = vpop.f32.mrb[5].mxu0  ;;  %v707_v50 = vpop.f32.mrb[5].mxu1  ;;  %v761_v51 = vmul.f32 %v745_v37, %v745_v37  ;;  %v737_v36 = vld [vmem:[%s1810_s17 + $0x58] sm:$0xff]  ;;  %v804_v38 = vadd.s32 %v1847_v0, %v787_v19 }
 0x25c   : > { %v760_v52 = vmul.f32 %v744_v41, %v744_v41  ;;  %v668_v53 = vadd.f32 %v1849_v1, %v667_v47  ;;  %v708_v30 = vadd.f32 %v1849_v1, %v707_v50  ;;  %v788_v40 = vadd.s32 96, %v1843_v62 }
 0x25d   : > { %v747_v55 = vsub.f32 %v673_v46, %v731_v43  ;;  %v860_v13 = vsel %vm812_vm2, %v761_v51, 0.0  ;;  %v767_v29 = vmul.f32 %v751_v23, %v751_v23  ;;  %vm819_vm10 = vcmp.lt.s32.totalorder %v803_v25, 270  ;;  %v739_v51 = vld [vmem:[%s1810_s17 + $0x68] sm:$0xff] }
 0x25e   : > { %v859_v58 = vsel %vm811_vm3, %v760_v52, 0.0  ;;  %v746_v59 = vsub.f32 %v668_v53, %v730_v48  ;;  %v1171_v60 = vpop.f32.mrb[6].mxu0  ;;  %v1183_v3 = vpop.f32.mrb[6].mxu1  ;;  %v789_v41 = vadd.s32 104, %v1843_v62  ;;  %v865_v43 = vsel %vm817_vm8, %v766_v26, 0.0  ;;  %v740_v53 = vld [vmem:[%s1810_s17 + $0x70] sm:$0xff] }
 0x25f   : > { %v875_v4 = vadd.f32 %v874_v45, %v859_v58  ;;  %v683_v5 = vadd.f32 %v1171_v60, %v1849_v1  ;;  %v677_v6 = vpop.f32.mrb[7].mxu0  ;;  %v717_v12 = vpop.f32.mrb[7].mxu1  ;;  %v763_v14 = vmul.f32 %v747_v55, %v747_v55  ;;  %v753_v45 = vsub.f32 %v703_v27, %v737_v36 }
 0x260   : > { %v762_v15 = vmul.f32 %v746_v59, %v746_v59  ;;  %v678_v16 = vadd.f32 %v1849_v1, %v677_v6  ;;  %v768_v46 = vmul.f32 %v752_v28, %v752_v28  ;;  %v713_v48 = vadd.f32 %v1887_v44, %v1849_v1 }
 0x261   : > { %v876_v17 = vadd.f32 %v875_v4, %v860_v13  ;;  %v749_v18 = vsub.f32 %v683_v5, %v733_v61  ;;  %v862_v31 = vsel %vm814_vm4, %v763_v14, 0.0  ;;  %v754_v49 = vsub.f32 %v708_v30, %v738_v39  ;;  %v741_v4 = vld [vmem:[%s1810_s17 + $0x78] sm:$0xff] }
 0x262   : > { %v861_v20 = vsel %vm813_vm5, %v762_v15, 0.0  ;;  %v748_v21 = vsub.f32 %v678_v16, %v732_v7  ;;  %v718_v35 = vadd.f32 %v1849_v1, %v717_v12  ;;  %v805_v52 = vadd.s32 %v1847_v0, %v788_v40 }
 0x263   : > { %v877_v22 = vadd.f32 %v876_v17, %v861_v20  ;;  %v765_v32 = vmul.f32 %v749_v18, %v749_v18  ;;  %vm820_vm11 = vcmp.lt.s32.totalorder %v804_v38, 270  ;;  %v806_v55 = vadd.s32 %v1847_v0, %v789_v41 }
 0x264   : > { %v764_v33 = vmul.f32 %v748_v21, %v748_v21  ;;  %v866_v34 = vsel %vm818_vm9, %v767_v29, 0.0  ;;  %v769_v58 = vmul.f32 %v753_v45, %v753_v45  ;;  %v867_v44 = vsel %vm819_vm10, %v768_v46, 0.0 }
 0x265   : > { %v878_v37 = vadd.f32 %v877_v22, %v862_v31  ;;  %v864_v47 = vsel %vm816_vm6, %v765_v32, 0.0  ;;  %v755_v59 = vsub.f32 %v713_v48, %v739_v51  ;;  %v770_v60 = vmul.f32 %v754_v49, %v754_v49  ;;  %v873_v22 = vld [vmem:[#allocation2] sm:$0x1] }
 0x266   : > { %v863_v24 = vsel %vm815_vm7, %v764_v33, 0.0  ;;  %v723_v61 = vadd.f32 %v1183_v3, %v1849_v1  ;;  %v756_v63 = vsub.f32 %v718_v35, %v740_v53  ;;  %vm821_vm12 = vcmp.lt.s32.totalorder %v805_v52, 270 }
 0x267   : > { %v879_v42 = vadd.f32 %v878_v37, %v863_v24  ;;  %v791_v5 = vadd.s32 120, %v1843_v62  ;;  %v807_v6 = vadd.s32 %v1847_v0, %v790_v54  ;;  %v868_v7 = vsel %vm820_vm11, %v769_v58, 0.0 }
 0x268   : > { %v771_v56 = vmul.f32 %v755_v59, %v755_v59  ;;  %v869_v10 = vsel %vm821_vm12, %v770_v60, 0.0  ;;  %v757_v11 = vsub.f32 %v723_v61, %v741_v4  ;;  %v772_v12 = vmul.f32 %v756_v63, %v756_v63 }
 0x269   : > { %v880_v50 = vadd.f32 %v879_v42, %v864_v47  ;;  %vm822_vm13 = vcmp.lt.s32.totalorder %v806_v55, 270  ;;  %v808_v14 = vadd.s32 %v1847_v0, %v791_v5  ;;  %vm823_vm14 = vcmp.lt.s32.totalorder %v807_v6, 270 }
 0x26a   : > { %v870_v3 = vsel %vm822_vm13, %v771_v56, 0.0  ;;  %v773_v15 = vmul.f32 %v757_v11, %v757_v11  ;;  %v871_v16 = vsel %vm823_vm14, %v772_v12, 0.0  ;;  %vm902_vm0 = vcmask (!%p1086_p9), 1040384  }
 0x26b   : > { %v881_v57 = vadd.f32 %v880_v50, %v865_v43  ;;  %vm824_vm15 = vcmp.lt.s32.totalorder %v808_v14, 270 }
 0x26c   : > { %v872_v17 = vsel %vm824_vm15, %v773_v15, 0.0 }
 0x26d   : > { %v882_v2 = vadd.f32 %v881_v57, %v866_v34 }
 0x26f   : > { %v883_v9 = vadd.f32 %v882_v2, %v867_v44 }
 0x271   : > { %v884_v13 = vadd.f32 %v883_v9, %v868_v7 }
 0x273   : > { %v885_v1 = vadd.f32 %v884_v13, %v869_v10 }
 0x275   : > { %v886_v8 = vadd.f32 %v885_v1, %v870_v3 }
 0x277   : > { %v887_v62 = vadd.f32 %v886_v8, %v871_v16 }
 0x279   : > { %v888_v18 = vadd.f32 %v887_v62, %v872_v17 }
 0x27b   : > { %v889_v19 = vrot.slane %v888_v18, 4 }
 0x27d   : > { %v890_v20 = vadd.f32 %v889_v19, %v888_v18 }
 0x27f   : > { %v891_v21 = vrot.slane %v890_v20, 2 }
 0x281   : > { %v892_v23 = vadd.f32 %v891_v21, %v890_v20 }
 0x283   : > { %v893_v25 = vrot.slane %v892_v23, 1  ;;  %900 = sbr.rel (%p1086_p9) target bundleno = 865 (0x361), region = 68 }
 0x285   : > { %v894_v26 = vadd.f32 %v893_v25, %v892_v23 }
 0x287   : > { %v895_v27 = vadd.f32 %v894_v26, %v873_v22 }
 0x289   : > { %896 = vst [vmem:[#allocation2] sm:$0x1] %v895_v27 }
 0x290   : > { %v901_v0 = vld [vmem:[#allocation2] sm:$0x1] }
 0x291   : > { %v903_v28 = vsel %vm902_vm0, %v901_v0, 0.0 }
 0x292   : > { %904 = vadd.xlane.f32.xlu0 %v903_v28 }
 0x31f   : > { %v905_v31 = vpop.xlane.xlu0 %904 }
 0x320   : > { %v906_v32 = vrot.slane %v905_v31, 4 }
 0x322   : > { %v907_v33 = vadd.f32 %v906_v32, %v905_v31 }
 0x324   : > { %v908_v36 = vrot.slane %v907_v33, 2 }
 0x326   : > { %v909_v30 = vadd.f32 %v908_v36, %v907_v33 }
 0x328   : > { %v910_v37 = vrot.slane %v909_v30, 1 }
 0x32a   : > { %v911_v38 = vadd.f32 %v910_v37, %v909_v30 }
 0x32c   : > { %1232 = vpush %v911_v38 }
 0x35d   : > { %s1233_s25 = spop %1232 }
 0x35e   : > { %s913_s12 = smul.f32 2.8935185e-05, %s1233_s25 }
 0x360   : > { %915 = sst [smem:[#allocation13]] %s913_s12 }
 0x361 PF: > { %p1275_p2 = scmp.eq.s32.totalorder %s1636_s9, 2  ;;  %s1438_s13 = scalar_lea.hbm %s2032_s6, 16 }
 0x362   : > { %p1439_p10 = scmp.ne.s32.totalorder %s2032_s6, %s1438_s13  ;;  %p1444_p6 = scmp.lt.u32.totalorder %s1438_s13, %s2032_s6 }
 0x364   : > { %p1440_p12 = pnand %p1439_p10, %p1275_p2 }
 0x366   : > { %p1441_p0 = pneg %p1440_p12 }
 0x368   : > { %p1446_p3 = pnand %p1444_p6, %p1441_p0 }
 0x36a   : > { %1449 = shalt.err (!%p1446_p3)
}
 0x36b   : > { %s1567_s27 = smov [#allocation13]   ;;  %s1568_s16 = smov [#allocation14]  }
 0x36c   : > { %1248 = dma.smem_to_hbm (%p1275_p2), %s1567_s27, 16, %s2032_s6, [#allocation7]  }
 0x36d   : > { %s931_s20 = sshll.u32 %s1568_s16, 4  ;;  %s932_s20 = int_to_ptr.vmem [resolvable:$true] %s931_s20 }
 0x36e   : > { %s1450_s22 = scalar_lea.vmem %s932_s20, 2048  ;;  %p1457_p1 = scmp.lt.s32.totalorder %s932_s20, %s932_s20 }
 0x36f   : > { %p1451_p7 = scmp.ne.s32.totalorder %s932_s20, %s1450_s22  ;;  %p1458_p4 = scmp.lt.s32.totalorder %s1450_s22, %s1450_s22 }
 0x371   : > { %p1452_p11 = pnand %p1451_p7, %p1275_p2  ;;  %p1459_p5 = por %p1458_p4, %p1457_p1 }
 0x373   : > { %p1453_p13 = pneg %p1452_p11 }
 0x375   : > { %p1460_p8 = pnand %p1459_p5, %p1453_p13 }
 0x377   : > { %1463 = shalt.err (!%p1460_p8)
}
 0x378   : > { %s1464_s15 = scalar_lea.hbm %s2033_s7, 2048 }
 0x379   : > { %p1465_p9 = scmp.ne.s32.totalorder %s2033_s7, %s1464_s15  ;;  %p1470_p0 = scmp.lt.u32.totalorder %s1464_s15, %s2033_s7 }
 0x37b   : > { %p1466_p10 = pnand %p1465_p9, %p1275_p2 }
 0x37d   : > { %p1467_p12 = pneg %p1466_p10 }
 0x37f   : > { %p1472_p6 = pnand %p1470_p0, %p1467_p12 }
 0x381   : > { %1475 = shalt.err (!%p1472_p6)
}
 0x382   : > { %s1569_s8 = smov 128   ;;  %s1570_s10 = smov 8  }
 0x383   : > { %1250 = dma.vmem_to_hbm [thread:$0]  (%p1275_p2), %s932_s20, 2048, %s2033_s7, [#allocation6], %s1569_s8, %s1569_s8, %s1570_s10  }
 0x384   : > { %s1571_s23 = smov [#allocation15]  }
 0x385   : > { %s945_s14 = sshll.u32 %s1571_s23, 4  ;;  %s946_s14 = int_to_ptr.vmem [resolvable:$true] %s945_s14 }
 0x386   : > { %s1476_s26 = scalar_lea.vmem %s946_s14, 16  ;;  %s1482_s27 = scalar_lea.vmem %s946_s14, 32 }
 0x387   : > { %p1477_p3 = scmp.ne.s32.totalorder %s946_s14, %s1476_s26  ;;  %p1483_p13 = scmp.lt.s32.totalorder %s946_s14, %s946_s14 }
 0x388   : > { %p1484_p1 = scmp.lt.s32.totalorder %s1482_s27, %s1476_s26 }
 0x389   : > { %p1478_p7 = pnand %p1477_p3, %p1275_p2 }
 0x38a   : > { %p1485_p4 = por %p1484_p1, %p1483_p13 }
 0x38b   : > { %p1479_p11 = pneg %p1478_p7 }
 0x38d   : > { %p1486_p5 = pnand %p1485_p4, %p1479_p11 }
 0x38f   : > { %1489 = shalt.err (!%p1486_p5)
}
 0x390   : > { %s2057_s16 = sld [smem:[#allocation25_spill]] }
 0x396   : > { %s1490_s22 = scalar_lea.hbm %s2057_s16, 16 }
 0x397   : > { %p1491_p8 = scmp.ne.s32.totalorder %s2057_s16, %s1490_s22  ;;  %p1496_p12 = scmp.lt.u32.totalorder %s1490_s22, %s2057_s16 }
 0x399   : > { %p1492_p9 = pnand %p1491_p8, %p1275_p2 }
 0x39b   : > { %p1493_p10 = pneg %p1492_p9 }
 0x39d   : > { %p1498_p0 = pnand %p1496_p12, %p1493_p10 }
 0x39f   : > { %1501 = shalt.err (!%p1498_p0)
}
 0x3a0   : > { %1252 = dma.vmem_to_hbm [thread:$0]  (%p1275_p2), %s946_s14, 16, %s2057_s16, [#allocation16]  }
 0x3a1   : > { %1531 = dma.done.wait (%p1275_p2), [#allocation7], 16  }
 0x3a2   : > { %1533 = vsyncadd (%p1275_p2), [#allocation7], 4294967280 }
 0x3a3   : > { %1535 = dma.done.wait (%p1275_p2), [#allocation6], 2048  }
 0x3a4   : > { %1537 = vsyncadd (%p1275_p2), [#allocation6], 4294965248 }
 0x3a5   : > { %1539 = dma.done.wait (%p1275_p2), [#allocation16], 16  }
 0x3a6   : > { %1541 = vsyncadd (%p1275_p2), [#allocation16], 4294967280 }
 0x3a7   : > { %961 = sfence }
 0x3a8 PF: > { %s2058_s30 = sld [smem:[#allocation23_spill]]  ;;  %s2059_s25 = sld [smem:[#allocation24_spill]] }
 0x3a9   : > { %s2060_s27 = smov %s1548_s28  ;;  %s2061_s28 = smov %s1552_s29 }
 0x3ae   : > { %p24_p6 = scmp.ge.s32.totalorder %s2058_s30, 5   ;;  %s2062_s29 = smov %s2059_s25 }
 0x3b0   :  { %26 = sbr.rel (!%p24_p6) target bundleno = 10 (0xa), region = 123 }
 0x3b7   :  { %967 = vsyncpa [#allocation5], 1 }
 0x3b8   :  { %969 = vsyncpa [#allocation5 + $0x1], 1 }
 0x3b9   :  { %970 = vsyncpa [#allocation9], 1 }
 0x3ba   :  { %971 = vsyncpa [#allocation12], 1 }
 0x3bb   :  { %973 = vsyncpa [#allocation12 + $0x1], 1 }
 0x3bc   :  { %974 = vsyncpa [#allocation6], 1 }
 0x3bd   :  { %976 = vsyncpa [#allocation6 + $0x1], 1 }
 0x3be   :  { %977 = vsyncpa [#allocation16], 1 }
 0x3bf   :  { %978 = vsyncpa [#allocation7], 1 }
 0x3c0   :  { %980 = vsyncpa [#allocation7 + $0x1], 1 }

</bundles_post_ra>
